<compile_context>
chip_gen: v7x
topology: tpu7x:2x2x1
jax: 0.10.0
libtpu: 0.0.40
codegen_flags: <defaults>
</compile_context>

<pallas_src>
import jax
import jax.numpy as jnp
from jax.experimental import pallas as pl
from jax.experimental.pallas import tpu as pltpu

# ----------------------------- hyper-parameters ------------------------------
B = 2                 # real batch
BP = 8                # batch padded to one f32 sublane group
SEQ = 8               # sequence length
CNN_IN = 4            # cnn_in_channels
CNN_OUT = 16          # cnn_out_channels1
KSIZE = 3             # cnn_kernel_size1
TP = SEQ - KSIZE + 1  # conv output length (stride=1, padding=0) = 6
HIDDEN = 32           # hidden_size
NUM_LAYERS = 2
RU_NUM, RU_DIM = 10, 8
MO_NUM, MO_DIM = 6, 4
STATIC_DIM = 5        # len(static_data)
FC_HIDDEN = 32
COMBINED = HIDDEN + RU_DIM + MO_DIM + STATIC_DIM    # 49
CONV_K = 16           # im2col row width: K*Cin=12 data + 1 ones(bias) + 3 zero

# lstm_slab row offsets (all multiples of 8; 128 lanes wide)
WIH0_R, WHH0_R, B0_R = 0, 32, 64          # wih0 padded to 32 rows (16 real)
WIH1_R, WHH1_R, B1_R = 72, 104, 136
LSTM_ROWS = 144

# head_slab row offsets (32 lanes wide)
W1H_R = 0             # w1[h-part]           (32, 32)
W1S_R = 32            # w1[static-part] pad  (8, 32)
RU_R = 40             # ru_tab @ w1[ru-part] (10, 32) padded to 16
MO_R = 56             # mo_tab @ w1[mo-part] (6, 32)  padded to 8
FCB1_R = 64           # fc1 bias row
W2_R = 65             # fc2 weight row (w2[:, 0])
FCB2_R = 66           # fc2 bias at [66, 0]
CONVW_R = 72          # conv weight (12 rows) + bias at row 84, 16 rows total
HEAD_ROWS = 88


# ------------------------------ pallas helpers -------------------------------
def _spec2d(shape):
    """Whole-array 2-D block; index_map also receives the prefetch ref(s)."""
    return pl.BlockSpec(shape, lambda i, *_: (0, 0))


# ------------------------------- fused kernel --------------------------------
def fused_kernel(idx_ref,          # SMEM (4,) int32: [ru0, ru1, mo0, mo1]
                 x_ref,            # (TP*BP, CONV_K) im2col rows, row r = t*BP + b
                 static_ref,       # (BP, 8)  static features, lanes 5:8 zero
                 lstm_ref,         # (144, 128) packed LSTM weights/biases
                 head_ref,         # (88, 32)   packed conv + head weights
                 out_ref):         # (BP, 1)
    H = HIDDEN

    # ---- Conv1d (+bias via ones-column) in ONE MXU dot, then SiLU ------------
    conv = jnp.dot(x_ref[...], head_ref[CONVW_R:CONVW_R + CONV_K, :],
                   preferred_element_type=jnp.float32)      # (48, 32); lanes 16:31 == 0
    conv = conv * jax.nn.sigmoid(conv)                       # SiLU (zeros stay zero)

    # fused gate layout along 128 lanes: [0:H)=i, [H:2H)=f, [2H:3H)=g, [3H:4H)=o
    lane = jax.lax.broadcasted_iota(jnp.int32, (BP, 4 * H), 1)
    is_g = jnp.logical_and(lane >= 2 * H, lane < 3 * H)

    def lstm_layer(xproj, whh):
        """xproj: (TP*BP, 4H) precomputed input projection (+bias)."""
        h = jnp.zeros((BP, H), jnp.float32)
        c = jnp.zeros((BP, H), jnp.float32)
        hs = []
        for t in range(TP):                                   # fully unrolled, TP=6
            g = xproj[t * BP:(t + 1) * BP, :] + jnp.dot(
                h, whh, preferred_element_type=jnp.float32)   # (BP, 4H)
            sig = jax.nn.sigmoid(g)                           # one EUP pass
            th = jnp.tanh(g)                                  # one EUP pass
            act = jnp.where(is_g, th, sig)                    # lane-mask select
            i = act[:, 0:H]
            f = act[:, H:2 * H]
            gg = act[:, 2 * H:3 * H]
            o = act[:, 3 * H:4 * H]
            c = f * c + i * gg
            h = o * jnp.tanh(c)
            hs.append(h)
        return h, hs

    # ---- layer 0: input projection hoisted out of the recurrence -------------
    xp0 = (jnp.dot(conv, lstm_ref[WIH0_R:WIH0_R + 32, :],
                   preferred_element_type=jnp.float32)
           + lstm_ref[B0_R:B0_R + 1, :])                      # (48, 128)
    _, hs0 = lstm_layer(xp0, lstm_ref[WHH0_R:WHH0_R + 32, :])
    # TODO(synk): nn.LSTM inter-layer dropout is identity in eval mode; skipped.

    # ---- layer 1: hidden sequence stays in registers -------------------------
    hstack = jnp.concatenate(hs0, axis=0)                     # (48, 32)
    xp1 = (jnp.dot(hstack, lstm_ref[WIH1_R:WIH1_R + 32, :],
                   preferred_element_type=jnp.float32)
           + lstm_ref[B1_R:B1_R + 1, :])                      # (48, 128)
    h_last, _ = lstm_layer(xp1, lstm_ref[WHH1_R:WHH1_R + 32, :])
    # h_last == h_n[-1] in PyTorch: (BP, HIDDEN), rows >= B are ignored garbage

    # ---- head: decomposed fc1 (embedding contributions pre-multiplied) -------
    ru_rows = jnp.concatenate(
        [head_ref[pl.ds(RU_R + idx_ref[b], 1), :] for b in range(B)]
        + [jnp.zeros((BP - B, FC_HIDDEN), jnp.float32)], axis=0)       # (BP, 32)
    mo_rows = jnp.concatenate(
        [head_ref[pl.ds(MO_R + idx_ref[B + b], 1), :] for b in range(B)]
        + [jnp.zeros((BP - B, FC_HIDDEN), jnp.float32)], axis=0)       # (BP, 32)

    h1 = (jnp.dot(h_last, head_ref[W1H_R:W1H_R + H, :],
                  preferred_element_type=jnp.float32)
          + jnp.dot(static_ref[...], head_ref[W1S_R:W1S_R + 8, :],
                    preferred_element_type=jnp.float32)
          + ru_rows + mo_rows
          + head_ref[FCB1_R:FCB1_R + 1, :])                   # (BP, 32)
    h1 = h1 * jax.nn.sigmoid(h1)                              # SiLU
    # TODO(synk): nn.Dropout is identity in eval mode; not applied.

    out = jnp.sum(h1 * head_ref[W2_R:W2_R + 1, :], axis=1, keepdims=True)  # (BP, 1)
    out_ref[...] = out + head_ref[FCB2_R:FCB2_R + 1, 0:1]


# ------------------------------ parameter setup ------------------------------
def init_params(key):
    keys = jax.random.split(key, 14)
    s = 0.1
    p = {}
    p['conv_w'] = s * jax.random.normal(keys[0], (KSIZE, CNN_IN, CNN_OUT), jnp.float32)
    p['conv_b'] = s * jax.random.normal(keys[1], (CNN_OUT,), jnp.float32)
    wih, whh, bl = [], [], []
    for l in range(NUM_LAYERS):
        din = CNN_OUT if l == 0 else HIDDEN
        k1, k2, k3 = jax.random.split(keys[2 + l], 3)
        # fused gate columns: [0:H)=i, [H:2H)=f, [2H:3H)=g, [3H:4H)=o
        wih.append(s * jax.random.normal(k1, (din, 4 * HIDDEN), jnp.float32))
        whh.append(s * jax.random.normal(k2, (HIDDEN, 4 * HIDDEN), jnp.float32))
        bl.append(s * jax.random.normal(k3, (4 * HIDDEN,), jnp.float32))
    p['wih'], p['whh'], p['b_lstm'] = wih, whh, bl
    p['ru_tab'] = s * jax.random.normal(keys[8], (RU_NUM, RU_DIM), jnp.float32)
    p['mo_tab'] = s * jax.random.normal(keys[9], (MO_NUM, MO_DIM), jnp.float32)
    p['w1'] = s * jax.random.normal(keys[10], (COMBINED, FC_HIDDEN), jnp.float32)
    p['b1'] = s * jax.random.normal(keys[11], (FC_HIDDEN,), jnp.float32)
    p['w2'] = s * jax.random.normal(keys[12], (FC_HIDDEN, 1), jnp.float32)
    p['b2'] = s * jax.random.normal(keys[13], (1,), jnp.float32)
    return p


def pack_params(p):
    """Build the two weight slabs ONCE (no per-forward wrapper-side weight ops)."""
    lstm = jnp.zeros((LSTM_ROWS, 4 * HIDDEN), jnp.float32)
    lstm = lstm.at[WIH0_R:WIH0_R + CNN_OUT, :].set(p['wih'][0])   # rows 16:32 stay 0
    lstm = lstm.at[WHH0_R:WHH0_R + HIDDEN, :].set(p['whh'][0])
    lstm = lstm.at[B0_R, :].set(p['b_lstm'][0])
    lstm = lstm.at[WIH1_R:WIH1_R + HIDDEN, :].set(p['wih'][1])
    lstm = lstm.at[WHH1_R:WHH1_R + HIDDEN, :].set(p['whh'][1])
    lstm = lstm.at[B1_R, :].set(p['b_lstm'][1])

    w1 = p['w1']
    w1_h = w1[0:HIDDEN]
    w1_ru = w1[HIDDEN:HIDDEN + RU_DIM]
    w1_mo = w1[HIDDEN + RU_DIM:HIDDEN + RU_DIM + MO_DIM]
    w1_s = w1[HIDDEN + RU_DIM + MO_DIM:COMBINED]

    head = jnp.zeros((HEAD_ROWS, FC_HIDDEN), jnp.float32)
    head = head.at[W1H_R:W1H_R + HIDDEN, :].set(w1_h)
    head = head.at[W1S_R:W1S_R + STATIC_DIM, :].set(w1_s)
    head = head.at[RU_R:RU_R + RU_NUM, :].set(p['ru_tab'] @ w1_ru)   # (10, 32)
    head = head.at[MO_R:MO_R + MO_NUM, :].set(p['mo_tab'] @ w1_mo)   # (6, 32)
    head = head.at[FCB1_R, :].set(p['b1'])
    head = head.at[W2_R, :].set(p['w2'][:, 0])
    head = head.at[FCB2_R, 0].set(p['b2'][0])
    head = head.at[CONVW_R:CONVW_R + KSIZE * CNN_IN, 0:CNN_OUT].set(
        p['conv_w'].reshape(KSIZE * CNN_IN, CNN_OUT))
    head = head.at[CONVW_R + KSIZE * CNN_IN, 0:CNN_OUT].set(p['conv_b'])
    return {'lstm_slab': lstm, 'head_slab': head}


# ------------------------------ model wrapper --------------------------------
def forward(packed, x_seq, x_static, ru_idx, mo_idx):
    # im2col input rows (row r = t*BP + b): cols k*CNN_IN + c = x_seq[b, t+k, c],
    # col 12 = 1.0 (conv bias), cols 13:16 = 0. Padded batch rows are zeros.
    wins = jnp.stack([x_seq[:, k:k + TP, :] for k in range(KSIZE)], axis=2)   # (B,TP,K,Cin)
    wins = jnp.transpose(wins.reshape(B, TP, KSIZE * CNN_IN), (1, 0, 2))      # (TP,B,12)
    x_im = jnp.zeros((TP, BP, CONV_K), jnp.float32)
    x_im = x_im.at[:, :B, :KSIZE * CNN_IN].set(wins)
    x_im = x_im.at[:, :, KSIZE * CNN_IN].set(1.0)
    x_im = x_im.reshape(TP * BP, CONV_K)

    static_pad = jnp.zeros((BP, 8), jnp.float32).at[:B, :STATIC_DIM].set(x_static)

    idx = jnp.concatenate([jnp.clip(ru_idx, 0, RU_NUM - 1),
                           jnp.clip(mo_idx, 0, MO_NUM - 1)]).astype(jnp.int32)  # (4,)

    tensor_inputs = (x_im, static_pad, packed['lstm_slab'], packed['head_slab'])
    grid_spec = pltpu.PrefetchScalarGridSpec(
        num_scalar_prefetch=1,                      # idx -> SMEM
        grid=(1,),
        in_specs=[_spec2d(a.shape) for a in tensor_inputs],
        out_specs=_spec2d((BP, 1)),
        scratch_shapes=[],
    )
    out = pl.pallas_call(
        fused_kernel,
        out_shape=jax.ShapeDtypeStruct((BP, 1), jnp.float32),
        grid_spec=grid_spec,
        compiler_params=pltpu.CompilerParams(dimension_semantics=("arbitrary",)),
    )(idx, *tensor_inputs)
    return out[:B, 0]                               # drop batch padding, squeeze(1)


# ------------------------- pure-JAX reference (check) ------------------------
def reference(params, x_seq, x_static, ru_idx, mo_idx):
    acc = jnp.zeros((B, TP, CNN_OUT), jnp.float32) + params['conv_b']
    for k in range(KSIZE):
        acc = acc + jnp.einsum('btc,co->bto', x_seq[:, k:k + TP, :], params['conv_w'][k])
    h_seq = jnp.transpose(acc * jax.nn.sigmoid(acc), (1, 0, 2))   # (TP, B, Cout)
    for l in range(NUM_LAYERS):
        wih, whh, bias = params['wih'][l], params['whh'][l], params['b_lstm'][l]

        def step(carry, xt, wih=wih, whh=whh, bias=bias):
            h, c = carry
            z = xt @ wih + h @ whh + bias
            i = jax.nn.sigmoid(z[:, 0:HIDDEN])
            f = jax.nn.sigmoid(z[:, HIDDEN:2 * HIDDEN])
            g = jnp.tanh(z[:, 2 * HIDDEN:3 * HIDDEN])
            o = jax.nn.sigmoid(z[:, 3 * HIDDEN:4 * HIDDEN])
            c = f * c + i * g
            h = o * jnp.tanh(c)
            return (h, c), h

        init = (jnp.zeros((B, HIDDEN)), jnp.zeros((B, HIDDEN)))
        _, h_seq = jax.lax.scan(step, init, h_seq)
    seq_feat = h_seq[-1]
    combined = jnp.concatenate(
        [seq_feat, params['ru_tab'][ru_idx], params['mo_tab'][mo_idx], x_static], axis=1)
    h = combined @ params['w1'] + params['b1']
    h = h * jax.nn.sigmoid(h)
    out = h @ params['w2'] + params['b2']
    return out[:, 0]


# ----------------------------------- main ------------------------------------
if __name__ == "__main__":
    key = jax.random.PRNGKey(0)
    kp, kx, ks, kr, km = jax.random.split(key, 5)
    params = init_params(kp)
    packed = pack_params(params)

    x_seq = jax.random.normal(kx, (B, SEQ, CNN_IN), jnp.float32)
    x_static = jax.random.normal(ks, (B, STATIC_DIM), jnp.float32)
    ru_idx = jax.random.randint(kr, (B,), 0, RU_NUM, dtype=jnp.int32)
    mo_idx = jax.random.randint(km, (B,), 0, MO_NUM, dtype=jnp.int32)

    fwd = jax.jit(forward)
    out = jax.block_until_ready(fwd(packed, x_seq, x_static, ru_idx, mo_idx))

    ref = reference(params, x_seq, x_static, ru_idx, mo_idx)
    if not jnp.allclose(out, ref, rtol=1e-3, atol=2e-4):
        raise AssertionError(f"Pallas/reference mismatch: {out} vs {ref}")
    print("KERNEL_OK")
</pallas_src>

<mosaic_0001>
module attributes {stable_mosaic.version = 11 : i64} {
  func.func @fused_kernel(%arg0: i32, %arg1: memref<4xi32, #tpu.memory_space<smem>>, %arg2: memref<48x16xf32, #tpu.memory_space<vmem>>, %arg3: memref<8x8xf32, #tpu.memory_space<vmem>>, %arg4: memref<144x128xf32, #tpu.memory_space<vmem>>, %arg5: memref<88x32xf32, #tpu.memory_space<vmem>>, %arg6: memref<8x1xf32, #tpu.memory_space<vmem>>) attributes {dimension_semantics = [#tpu.dimension_semantics<arbitrary>], iteration_bounds = array<i64: 1>, scalar_prefetch = 1 : i64, scratch_operands = 0 : i64, tpu.core_type = #tpu.core_type<tc>, window_params = [{pipeline_mode = #tpu.pipeline_mode<synchronous>, transform_indices = @transform_0, window_bounds = array<i64: 48, 16>}, {pipeline_mode = #tpu.pipeline_mode<synchronous>, transform_indices = @transform_1, window_bounds = array<i64: 8, 8>}, {pipeline_mode = #tpu.pipeline_mode<synchronous>, transform_indices = @transform_2, window_bounds = array<i64: 144, 128>}, {pipeline_mode = #tpu.pipeline_mode<synchronous>, transform_indices = @transform_3, window_bounds = array<i64: 88, 32>}, {pipeline_mode = #tpu.pipeline_mode<synchronous>, transform_indices = @transform_4, window_bounds = array<i64: 8, 1>}]} {
    %c0 = arith.constant 0 : index
    %c0_0 = arith.constant 0 : index
    %0 = vector.load %arg2[%c0, %c0_0] : memref<48x16xf32, #tpu.memory_space<vmem>>, vector<48x16xf32>
    %c72 = arith.constant 72 : index
    %c0_1 = arith.constant 0 : index
    %1 = vector.load %arg5[%c72, %c0_1] : memref<88x32xf32, #tpu.memory_space<vmem>>, vector<16x32xf32>
    %cst = arith.constant dense<0.000000e+00> : vector<48x32xf32>
    %2 = tpu.matmul %0, %1, %cst {dimension_numbers = #tpu.dot_dimension_numbers<[1], [0], [0], [1], [0, 0, 1, 1], [], []>} : vector<48x16xf32>, vector<16x32xf32>, vector<48x32xf32> -> vector<48x32xf32>
    %3 = arith.negf %2 : vector<48x32xf32>
    %4 = math.exp %3 : vector<48x32xf32>
    %cst_2 = arith.constant 1.000000e+00 : f32
    %5 = vector.broadcast %cst_2 : f32 to vector<48x32xf32>
    %6 = arith.addf %5, %4 : vector<48x32xf32>
    %7 = arith.divf %5, %6 : vector<48x32xf32>
    %8 = arith.mulf %2, %7 : vector<48x32xf32>
    %9 = tpu.iota {dimensions = array<i32: 1>} : vector<8x128xi32>
    %c64_i32 = arith.constant 64 : i32
    %10 = vector.broadcast %c64_i32 : i32 to vector<8x128xi32>
    %11 = arith.cmpi sge, %9, %10 : vector<8x128xi32>
    %c96_i32 = arith.constant 96 : i32
    %12 = vector.broadcast %c96_i32 : i32 to vector<8x128xi32>
    %13 = arith.cmpi slt, %9, %12 : vector<8x128xi32>
    %14 = arith.andi %11, %13 : vector<8x128xi1>
    %c0_3 = arith.constant 0 : index
    %c0_4 = arith.constant 0 : index
    %15 = vector.load %arg4[%c0_3, %c0_4] : memref<144x128xf32, #tpu.memory_space<vmem>>, vector<32x128xf32>
    %cst_5 = arith.constant dense<0.000000e+00> : vector<48x128xf32>
    %16 = tpu.matmul %8, %15, %cst_5 {dimension_numbers = #tpu.dot_dimension_numbers<[1], [0], [0], [1], [0, 0, 1, 1], [], []>} : vector<48x32xf32>, vector<32x128xf32>, vector<48x128xf32> -> vector<48x128xf32>
    %c64 = arith.constant 64 : index
    %c0_6 = arith.constant 0 : index
    %17 = vector.load %arg4[%c64, %c0_6] : memref<144x128xf32, #tpu.memory_space<vmem>>, vector<1x128xf32>
    %18 = vector.broadcast %17 : vector<1x128xf32> to vector<48x128xf32>
    %19 = arith.addf %16, %18 : vector<48x128xf32>
    %c32 = arith.constant 32 : index
    %c0_7 = arith.constant 0 : index
    %20 = vector.load %arg4[%c32, %c0_7] : memref<144x128xf32, #tpu.memory_space<vmem>>, vector<32x128xf32>
    %cst_8 = arith.constant 0.000000e+00 : f32
    %21 = vector.broadcast %cst_8 : f32 to vector<8x32xf32>
    %cst_9 = arith.constant 0.000000e+00 : f32
    %22 = vector.broadcast %cst_9 : f32 to vector<8x32xf32>
    %23 = vector.extract_strided_slice %19 {offsets = [0, 0], sizes = [8, 128], strides = [1, 1]} : vector<48x128xf32> to vector<8x128xf32>
    %cst_10 = arith.constant dense<0.000000e+00> : vector<8x128xf32>
    %24 = tpu.matmul %21, %20, %cst_10 {dimension_numbers = #tpu.dot_dimension_numbers<[1], [0], [0], [1], [0, 0, 1, 1], [], []>} : vector<8x32xf32>, vector<32x128xf32>, vector<8x128xf32> -> vector<8x128xf32>
    %25 = arith.addf %23, %24 : vector<8x128xf32>
    %26 = arith.negf %25 : vector<8x128xf32>
    %27 = math.exp %26 : vector<8x128xf32>
    %cst_11 = arith.constant 1.000000e+00 : f32
    %28 = vector.broadcast %cst_11 : f32 to vector<8x128xf32>
    %29 = arith.addf %28, %27 : vector<8x128xf32>
    %30 = arith.divf %28, %29 : vector<8x128xf32>
    %31 = math.tanh %25 : vector<8x128xf32>
    %32 = arith.select %14, %31, %30 : vector<8x128xi1>, vector<8x128xf32>
    %33 = vector.extract_strided_slice %32 {offsets = [0, 0], sizes = [8, 32], strides = [1, 1]} : vector<8x128xf32> to vector<8x32xf32>
    %34 = vector.extract_strided_slice %32 {offsets = [0, 32], sizes = [8, 32], strides = [1, 1]} : vector<8x128xf32> to vector<8x32xf32>
    %35 = vector.extract_strided_slice %32 {offsets = [0, 64], sizes = [8, 32], strides = [1, 1]} : vector<8x128xf32> to vector<8x32xf32>
    %36 = vector.extract_strided_slice %32 {offsets = [0, 96], sizes = [8, 32], strides = [1, 1]} : vector<8x128xf32> to vector<8x32xf32>
    %37 = arith.mulf %34, %22 : vector<8x32xf32>
    %38 = arith.mulf %33, %35 : vector<8x32xf32>
    %39 = arith.addf %37, %38 : vector<8x32xf32>
    %40 = math.tanh %39 : vector<8x32xf32>
    %41 = arith.mulf %36, %40 : vector<8x32xf32>
    %42 = vector.extract_strided_slice %19 {offsets = [8, 0], sizes = [8, 128], strides = [1, 1]} : vector<48x128xf32> to vector<8x128xf32>
    %cst_12 = arith.constant dense<0.000000e+00> : vector<8x128xf32>
    %43 = tpu.matmul %41, %20, %cst_12 {dimension_numbers = #tpu.dot_dimension_numbers<[1], [0], [0], [1], [0, 0, 1, 1], [], []>} : vector<8x32xf32>, vector<32x128xf32>, vector<8x128xf32> -> vector<8x128xf32>
    %44 = arith.addf %42, %43 : vector<8x128xf32>
    %45 = arith.negf %44 : vector<8x128xf32>
    %46 = math.exp %45 : vector<8x128xf32>
    %cst_13 = arith.constant 1.000000e+00 : f32
    %47 = vector.broadcast %cst_13 : f32 to vector<8x128xf32>
    %48 = arith.addf %47, %46 : vector<8x128xf32>
    %49 = arith.divf %47, %48 : vector<8x128xf32>
    %50 = math.tanh %44 : vector<8x128xf32>
    %51 = arith.select %14, %50, %49 : vector<8x128xi1>, vector<8x128xf32>
    %52 = vector.extract_strided_slice %51 {offsets = [0, 0], sizes = [8, 32], strides = [1, 1]} : vector<8x128xf32> to vector<8x32xf32>
    %53 = vector.extract_strided_slice %51 {offsets = [0, 32], sizes = [8, 32], strides = [1, 1]} : vector<8x128xf32> to vector<8x32xf32>
    %54 = vector.extract_strided_slice %51 {offsets = [0, 64], sizes = [8, 32], strides = [1, 1]} : vector<8x128xf32> to vector<8x32xf32>
    %55 = vector.extract_strided_slice %51 {offsets = [0, 96], sizes = [8, 32], strides = [1, 1]} : vector<8x128xf32> to vector<8x32xf32>
    %56 = arith.mulf %53, %39 : vector<8x32xf32>
    %57 = arith.mulf %52, %54 : vector<8x32xf32>
    %58 = arith.addf %56, %57 : vector<8x32xf32>
    %59 = math.tanh %58 : vector<8x32xf32>
    %60 = arith.mulf %55, %59 : vector<8x32xf32>
    %61 = vector.extract_strided_slice %19 {offsets = [16, 0], sizes = [8, 128], strides = [1, 1]} : vector<48x128xf32> to vector<8x128xf32>
    %cst_14 = arith.constant dense<0.000000e+00> : vector<8x128xf32>
    %62 = tpu.matmul %60, %20, %cst_14 {dimension_numbers = #tpu.dot_dimension_numbers<[1], [0], [0], [1], [0, 0, 1, 1], [], []>} : vector<8x32xf32>, vector<32x128xf32>, vector<8x128xf32> -> vector<8x128xf32>
    %63 = arith.addf %61, %62 : vector<8x128xf32>
    %64 = arith.negf %63 : vector<8x128xf32>
    %65 = math.exp %64 : vector<8x128xf32>
    %cst_15 = arith.constant 1.000000e+00 : f32
    %66 = vector.broadcast %cst_15 : f32 to vector<8x128xf32>
    %67 = arith.addf %66, %65 : vector<8x128xf32>
    %68 = arith.divf %66, %67 : vector<8x128xf32>
    %69 = math.tanh %63 : vector<8x128xf32>
    %70 = arith.select %14, %69, %68 : vector<8x128xi1>, vector<8x128xf32>
    %71 = vector.extract_strided_slice %70 {offsets = [0, 0], sizes = [8, 32], strides = [1, 1]} : vector<8x128xf32> to vector<8x32xf32>
    %72 = vector.extract_strided_slice %70 {offsets = [0, 32], sizes = [8, 32], strides = [1, 1]} : vector<8x128xf32> to vector<8x32xf32>
    %73 = vector.extract_strided_slice %70 {offsets = [0, 64], sizes = [8, 32], strides = [1, 1]} : vector<8x128xf32> to vector<8x32xf32>
    %74 = vector.extract_strided_slice %70 {offsets = [0, 96], sizes = [8, 32], strides = [1, 1]} : vector<8x128xf32> to vector<8x32xf32>
    %75 = arith.mulf %72, %58 : vector<8x32xf32>
    %76 = arith.mulf %71, %73 : vector<8x32xf32>
    %77 = arith.addf %75, %76 : vector<8x32xf32>
    %78 = math.tanh %77 : vector<8x32xf32>
    %79 = arith.mulf %74, %78 : vector<8x32xf32>
    %80 = vector.extract_strided_slice %19 {offsets = [24, 0], sizes = [8, 128], strides = [1, 1]} : vector<48x128xf32> to vector<8x128xf32>
    %cst_16 = arith.constant dense<0.000000e+00> : vector<8x128xf32>
    %81 = tpu.matmul %79, %20, %cst_16 {dimension_numbers = #tpu.dot_dimension_numbers<[1], [0], [0], [1], [0, 0, 1, 1], [], []>} : vector<8x32xf32>, vector<32x128xf32>, vector<8x128xf32> -> vector<8x128xf32>
    %82 = arith.addf %80, %81 : vector<8x128xf32>
    %83 = arith.negf %82 : vector<8x128xf32>
    %84 = math.exp %83 : vector<8x128xf32>
    %cst_17 = arith.constant 1.000000e+00 : f32
    %85 = vector.broadcast %cst_17 : f32 to vector<8x128xf32>
    %86 = arith.addf %85, %84 : vector<8x128xf32>
    %87 = arith.divf %85, %86 : vector<8x128xf32>
    %88 = math.tanh %82 : vector<8x128xf32>
    %89 = arith.select %14, %88, %87 : vector<8x128xi1>, vector<8x128xf32>
    %90 = vector.extract_strided_slice %89 {offsets = [0, 0], sizes = [8, 32], strides = [1, 1]} : vector<8x128xf32> to vector<8x32xf32>
    %91 = vector.extract_strided_slice %89 {offsets = [0, 32], sizes = [8, 32], strides = [1, 1]} : vector<8x128xf32> to vector<8x32xf32>
    %92 = vector.extract_strided_slice %89 {offsets = [0, 64], sizes = [8, 32], strides = [1, 1]} : vector<8x128xf32> to vector<8x32xf32>
    %93 = vector.extract_strided_slice %89 {offsets = [0, 96], sizes = [8, 32], strides = [1, 1]} : vector<8x128xf32> to vector<8x32xf32>
    %94 = arith.mulf %91, %77 : vector<8x32xf32>
    %95 = arith.mulf %90, %92 : vector<8x32xf32>
    %96 = arith.addf %94, %95 : vector<8x32xf32>
    %97 = math.tanh %96 : vector<8x32xf32>
    %98 = arith.mulf %93, %97 : vector<8x32xf32>
    %99 = vector.extract_strided_slice %19 {offsets = [32, 0], sizes = [8, 128], strides = [1, 1]} : vector<48x128xf32> to vector<8x128xf32>
    %cst_18 = arith.constant dense<0.000000e+00> : vector<8x128xf32>
    %100 = tpu.matmul %98, %20, %cst_18 {dimension_numbers = #tpu.dot_dimension_numbers<[1], [0], [0], [1], [0, 0, 1, 1], [], []>} : vector<8x32xf32>, vector<32x128xf32>, vector<8x128xf32> -> vector<8x128xf32>
    %101 = arith.addf %99, %100 : vector<8x128xf32>
    %102 = arith.negf %101 : vector<8x128xf32>
    %103 = math.exp %102 : vector<8x128xf32>
    %cst_19 = arith.constant 1.000000e+00 : f32
    %104 = vector.broadcast %cst_19 : f32 to vector<8x128xf32>
    %105 = arith.addf %104, %103 : vector<8x128xf32>
    %106 = arith.divf %104, %105 : vector<8x128xf32>
    %107 = math.tanh %101 : vector<8x128xf32>
    %108 = arith.select %14, %107, %106 : vector<8x128xi1>, vector<8x128xf32>
    %109 = vector.extract_strided_slice %108 {offsets = [0, 0], sizes = [8, 32], strides = [1, 1]} : vector<8x128xf32> to vector<8x32xf32>
    %110 = vector.extract_strided_slice %108 {offsets = [0, 32], sizes = [8, 32], strides = [1, 1]} : vector<8x128xf32> to vector<8x32xf32>
    %111 = vector.extract_strided_slice %108 {offsets = [0, 64], sizes = [8, 32], strides = [1, 1]} : vector<8x128xf32> to vector<8x32xf32>
    %112 = vector.extract_strided_slice %108 {offsets = [0, 96], sizes = [8, 32], strides = [1, 1]} : vector<8x128xf32> to vector<8x32xf32>
    %113 = arith.mulf %110, %96 : vector<8x32xf32>
    %114 = arith.mulf %109, %111 : vector<8x32xf32>
    %115 = arith.addf %113, %114 : vector<8x32xf32>
    %116 = math.tanh %115 : vector<8x32xf32>
    %117 = arith.mulf %112, %116 : vector<8x32xf32>
    %118 = vector.extract_strided_slice %19 {offsets = [40, 0], sizes = [8, 128], strides = [1, 1]} : vector<48x128xf32> to vector<8x128xf32>
    %cst_20 = arith.constant dense<0.000000e+00> : vector<8x128xf32>
    %119 = tpu.matmul %117, %20, %cst_20 {dimension_numbers = #tpu.dot_dimension_numbers<[1], [0], [0], [1], [0, 0, 1, 1], [], []>} : vector<8x32xf32>, vector<32x128xf32>, vector<8x128xf32> -> vector<8x128xf32>
    %120 = arith.addf %118, %119 : vector<8x128xf32>
    %121 = arith.negf %120 : vector<8x128xf32>
    %122 = math.exp %121 : vector<8x128xf32>
    %cst_21 = arith.constant 1.000000e+00 : f32
    %123 = vector.broadcast %cst_21 : f32 to vector<8x128xf32>
    %124 = arith.addf %123, %122 : vector<8x128xf32>
    %125 = arith.divf %123, %124 : vector<8x128xf32>
    %126 = math.tanh %120 : vector<8x128xf32>
    %127 = arith.select %14, %126, %125 : vector<8x128xi1>, vector<8x128xf32>
    %128 = vector.extract_strided_slice %127 {offsets = [0, 0], sizes = [8, 32], strides = [1, 1]} : vector<8x128xf32> to vector<8x32xf32>
    %129 = vector.extract_strided_slice %127 {offsets = [0, 32], sizes = [8, 32], strides = [1, 1]} : vector<8x128xf32> to vector<8x32xf32>
    %130 = vector.extract_strided_slice %127 {offsets = [0, 64], sizes = [8, 32], strides = [1, 1]} : vector<8x128xf32> to vector<8x32xf32>
    %131 = vector.extract_strided_slice %127 {offsets = [0, 96], sizes = [8, 32], strides = [1, 1]} : vector<8x128xf32> to vector<8x32xf32>
    %132 = arith.mulf %129, %115 : vector<8x32xf32>
    %133 = arith.mulf %128, %130 : vector<8x32xf32>
    %134 = arith.addf %132, %133 : vector<8x32xf32>
    %135 = math.tanh %134 : vector<8x32xf32>
    %136 = arith.mulf %131, %135 : vector<8x32xf32>
    %137 = tpu.concatenate %41, %60, %79, %98, %117, %136 in 0 : vector<8x32xf32>, vector<8x32xf32>, vector<8x32xf32>, vector<8x32xf32>, vector<8x32xf32>, vector<8x32xf32> -> vector<48x32xf32>
    %c72_22 = arith.constant 72 : index
    %c0_23 = arith.constant 0 : index
    %138 = vector.load %arg4[%c72_22, %c0_23] : memref<144x128xf32, #tpu.memory_space<vmem>>, vector<32x128xf32>
    %cst_24 = arith.constant dense<0.000000e+00> : vector<48x128xf32>
    %139 = tpu.matmul %137, %138, %cst_24 {dimension_numbers = #tpu.dot_dimension_numbers<[1], [0], [0], [1], [0, 0, 1, 1], [], []>} : vector<48x32xf32>, vector<32x128xf32>, vector<48x128xf32> -> vector<48x128xf32>
    %c136 = arith.constant 136 : index
    %c0_25 = arith.constant 0 : index
    %140 = vector.load %arg4[%c136, %c0_25] : memref<144x128xf32, #tpu.memory_space<vmem>>, vector<1x128xf32>
    %141 = vector.broadcast %140 : vector<1x128xf32> to vector<48x128xf32>
    %142 = arith.addf %139, %141 : vector<48x128xf32>
    %c104 = arith.constant 104 : index
    %c0_26 = arith.constant 0 : index
    %143 = vector.load %arg4[%c104, %c0_26] : memref<144x128xf32, #tpu.memory_space<vmem>>, vector<32x128xf32>
    %cst_27 = arith.constant 0.000000e+00 : f32
    %144 = vector.broadcast %cst_27 : f32 to vector<8x32xf32>
    %cst_28 = arith.constant 0.000000e+00 : f32
    %145 = vector.broadcast %cst_28 : f32 to vector<8x32xf32>
    %146 = vector.extract_strided_slice %142 {offsets = [0, 0], sizes = [8, 128], strides = [1, 1]} : vector<48x128xf32> to vector<8x128xf32>
    %cst_29 = arith.constant dense<0.000000e+00> : vector<8x128xf32>
    %147 = tpu.matmul %144, %143, %cst_29 {dimension_numbers = #tpu.dot_dimension_numbers<[1], [0], [0], [1], [0, 0, 1, 1], [], []>} : vector<8x32xf32>, vector<32x128xf32>, vector<8x128xf32> -> vector<8x128xf32>
    %148 = arith.addf %146, %147 : vector<8x128xf32>
    %149 = arith.negf %148 : vector<8x128xf32>
    %150 = math.exp %149 : vector<8x128xf32>
    %cst_30 = arith.constant 1.000000e+00 : f32
    %151 = vector.broadcast %cst_30 : f32 to vector<8x128xf32>
    %152 = arith.addf %151, %150 : vector<8x128xf32>
    %153 = arith.divf %151, %152 : vector<8x128xf32>
    %154 = math.tanh %148 : vector<8x128xf32>
    %155 = arith.select %14, %154, %153 : vector<8x128xi1>, vector<8x128xf32>
    %156 = vector.extract_strided_slice %155 {offsets = [0, 0], sizes = [8, 32], strides = [1, 1]} : vector<8x128xf32> to vector<8x32xf32>
    %157 = vector.extract_strided_slice %155 {offsets = [0, 32], sizes = [8, 32], strides = [1, 1]} : vector<8x128xf32> to vector<8x32xf32>
    %158 = vector.extract_strided_slice %155 {offsets = [0, 64], sizes = [8, 32], strides = [1, 1]} : vector<8x128xf32> to vector<8x32xf32>
    %159 = vector.extract_strided_slice %155 {offsets = [0, 96], sizes = [8, 32], strides = [1, 1]} : vector<8x128xf32> to vector<8x32xf32>
    %160 = arith.mulf %157, %145 : vector<8x32xf32>
    %161 = arith.mulf %156, %158 : vector<8x32xf32>
    %162 = arith.addf %160, %161 : vector<8x32xf32>
    %163 = math.tanh %162 : vector<8x32xf32>
    %164 = arith.mulf %159, %163 : vector<8x32xf32>
    %165 = vector.extract_strided_slice %142 {offsets = [8, 0], sizes = [8, 128], strides = [1, 1]} : vector<48x128xf32> to vector<8x128xf32>
    %cst_31 = arith.constant dense<0.000000e+00> : vector<8x128xf32>
    %166 = tpu.matmul %164, %143, %cst_31 {dimension_numbers = #tpu.dot_dimension_numbers<[1], [0], [0], [1], [0, 0, 1, 1], [], []>} : vector<8x32xf32>, vector<32x128xf32>, vector<8x128xf32> -> vector<8x128xf32>
    %167 = arith.addf %165, %166 : vector<8x128xf32>
    %168 = arith.negf %167 : vector<8x128xf32>
    %169 = math.exp %168 : vector<8x128xf32>
    %cst_32 = arith.constant 1.000000e+00 : f32
    %170 = vector.broadcast %cst_32 : f32 to vector<8x128xf32>
    %171 = arith.addf %170, %169 : vector<8x128xf32>
    %172 = arith.divf %170, %171 : vector<8x128xf32>
    %173 = math.tanh %167 : vector<8x128xf32>
    %174 = arith.select %14, %173, %172 : vector<8x128xi1>, vector<8x128xf32>
    %175 = vector.extract_strided_slice %174 {offsets = [0, 0], sizes = [8, 32], strides = [1, 1]} : vector<8x128xf32> to vector<8x32xf32>
    %176 = vector.extract_strided_slice %174 {offsets = [0, 32], sizes = [8, 32], strides = [1, 1]} : vector<8x128xf32> to vector<8x32xf32>
    %177 = vector.extract_strided_slice %174 {offsets = [0, 64], sizes = [8, 32], strides = [1, 1]} : vector<8x128xf32> to vector<8x32xf32>
    %178 = vector.extract_strided_slice %174 {offsets = [0, 96], sizes = [8, 32], strides = [1, 1]} : vector<8x128xf32> to vector<8x32xf32>
    %179 = arith.mulf %176, %162 : vector<8x32xf32>
    %180 = arith.mulf %175, %177 : vector<8x32xf32>
    %181 = arith.addf %179, %180 : vector<8x32xf32>
    %182 = math.tanh %181 : vector<8x32xf32>
    %183 = arith.mulf %178, %182 : vector<8x32xf32>
    %184 = vector.extract_strided_slice %142 {offsets = [16, 0], sizes = [8, 128], strides = [1, 1]} : vector<48x128xf32> to vector<8x128xf32>
    %cst_33 = arith.constant dense<0.000000e+00> : vector<8x128xf32>
    %185 = tpu.matmul %183, %143, %cst_33 {dimension_numbers = #tpu.dot_dimension_numbers<[1], [0], [0], [1], [0, 0, 1, 1], [], []>} : vector<8x32xf32>, vector<32x128xf32>, vector<8x128xf32> -> vector<8x128xf32>
    %186 = arith.addf %184, %185 : vector<8x128xf32>
    %187 = arith.negf %186 : vector<8x128xf32>
    %188 = math.exp %187 : vector<8x128xf32>
    %cst_34 = arith.constant 1.000000e+00 : f32
    %189 = vector.broadcast %cst_34 : f32 to vector<8x128xf32>
    %190 = arith.addf %189, %188 : vector<8x128xf32>
    %191 = arith.divf %189, %190 : vector<8x128xf32>
    %192 = math.tanh %186 : vector<8x128xf32>
    %193 = arith.select %14, %192, %191 : vector<8x128xi1>, vector<8x128xf32>
    %194 = vector.extract_strided_slice %193 {offsets = [0, 0], sizes = [8, 32], strides = [1, 1]} : vector<8x128xf32> to vector<8x32xf32>
    %195 = vector.extract_strided_slice %193 {offsets = [0, 32], sizes = [8, 32], strides = [1, 1]} : vector<8x128xf32> to vector<8x32xf32>
    %196 = vector.extract_strided_slice %193 {offsets = [0, 64], sizes = [8, 32], strides = [1, 1]} : vector<8x128xf32> to vector<8x32xf32>
    %197 = vector.extract_strided_slice %193 {offsets = [0, 96], sizes = [8, 32], strides = [1, 1]} : vector<8x128xf32> to vector<8x32xf32>
    %198 = arith.mulf %195, %181 : vector<8x32xf32>
    %199 = arith.mulf %194, %196 : vector<8x32xf32>
    %200 = arith.addf %198, %199 : vector<8x32xf32>
    %201 = math.tanh %200 : vector<8x32xf32>
    %202 = arith.mulf %197, %201 : vector<8x32xf32>
    %203 = vector.extract_strided_slice %142 {offsets = [24, 0], sizes = [8, 128], strides = [1, 1]} : vector<48x128xf32> to vector<8x128xf32>
    %cst_35 = arith.constant dense<0.000000e+00> : vector<8x128xf32>
    %204 = tpu.matmul %202, %143, %cst_35 {dimension_numbers = #tpu.dot_dimension_numbers<[1], [0], [0], [1], [0, 0, 1, 1], [], []>} : vector<8x32xf32>, vector<32x128xf32>, vector<8x128xf32> -> vector<8x128xf32>
    %205 = arith.addf %203, %204 : vector<8x128xf32>
    %206 = arith.negf %205 : vector<8x128xf32>
    %207 = math.exp %206 : vector<8x128xf32>
    %cst_36 = arith.constant 1.000000e+00 : f32
    %208 = vector.broadcast %cst_36 : f32 to vector<8x128xf32>
    %209 = arith.addf %208, %207 : vector<8x128xf32>
    %210 = arith.divf %208, %209 : vector<8x128xf32>
    %211 = math.tanh %205 : vector<8x128xf32>
    %212 = arith.select %14, %211, %210 : vector<8x128xi1>, vector<8x128xf32>
    %213 = vector.extract_strided_slice %212 {offsets = [0, 0], sizes = [8, 32], strides = [1, 1]} : vector<8x128xf32> to vector<8x32xf32>
    %214 = vector.extract_strided_slice %212 {offsets = [0, 32], sizes = [8, 32], strides = [1, 1]} : vector<8x128xf32> to vector<8x32xf32>
    %215 = vector.extract_strided_slice %212 {offsets = [0, 64], sizes = [8, 32], strides = [1, 1]} : vector<8x128xf32> to vector<8x32xf32>
    %216 = vector.extract_strided_slice %212 {offsets = [0, 96], sizes = [8, 32], strides = [1, 1]} : vector<8x128xf32> to vector<8x32xf32>
    %217 = arith.mulf %214, %200 : vector<8x32xf32>
    %218 = arith.mulf %213, %215 : vector<8x32xf32>
    %219 = arith.addf %217, %218 : vector<8x32xf32>
    %220 = math.tanh %219 : vector<8x32xf32>
    %221 = arith.mulf %216, %220 : vector<8x32xf32>
    %222 = vector.extract_strided_slice %142 {offsets = [32, 0], sizes = [8, 128], strides = [1, 1]} : vector<48x128xf32> to vector<8x128xf32>
    %cst_37 = arith.constant dense<0.000000e+00> : vector<8x128xf32>
    %223 = tpu.matmul %221, %143, %cst_37 {dimension_numbers = #tpu.dot_dimension_numbers<[1], [0], [0], [1], [0, 0, 1, 1], [], []>} : vector<8x32xf32>, vector<32x128xf32>, vector<8x128xf32> -> vector<8x128xf32>
    %224 = arith.addf %222, %223 : vector<8x128xf32>
    %225 = arith.negf %224 : vector<8x128xf32>
    %226 = math.exp %225 : vector<8x128xf32>
    %cst_38 = arith.constant 1.000000e+00 : f32
    %227 = vector.broadcast %cst_38 : f32 to vector<8x128xf32>
    %228 = arith.addf %227, %226 : vector<8x128xf32>
    %229 = arith.divf %227, %228 : vector<8x128xf32>
    %230 = math.tanh %224 : vector<8x128xf32>
    %231 = arith.select %14, %230, %229 : vector<8x128xi1>, vector<8x128xf32>
    %232 = vector.extract_strided_slice %231 {offsets = [0, 0], sizes = [8, 32], strides = [1, 1]} : vector<8x128xf32> to vector<8x32xf32>
    %233 = vector.extract_strided_slice %231 {offsets = [0, 32], sizes = [8, 32], strides = [1, 1]} : vector<8x128xf32> to vector<8x32xf32>
    %234 = vector.extract_strided_slice %231 {offsets = [0, 64], sizes = [8, 32], strides = [1, 1]} : vector<8x128xf32> to vector<8x32xf32>
    %235 = vector.extract_strided_slice %231 {offsets = [0, 96], sizes = [8, 32], strides = [1, 1]} : vector<8x128xf32> to vector<8x32xf32>
    %236 = arith.mulf %233, %219 : vector<8x32xf32>
    %237 = arith.mulf %232, %234 : vector<8x32xf32>
    %238 = arith.addf %236, %237 : vector<8x32xf32>
    %239 = math.tanh %238 : vector<8x32xf32>
    %240 = arith.mulf %235, %239 : vector<8x32xf32>
    %241 = vector.extract_strided_slice %142 {offsets = [40, 0], sizes = [8, 128], strides = [1, 1]} : vector<48x128xf32> to vector<8x128xf32>
    %cst_39 = arith.constant dense<0.000000e+00> : vector<8x128xf32>
    %242 = tpu.matmul %240, %143, %cst_39 {dimension_numbers = #tpu.dot_dimension_numbers<[1], [0], [0], [1], [0, 0, 1, 1], [], []>} : vector<8x32xf32>, vector<32x128xf32>, vector<8x128xf32> -> vector<8x128xf32>
    %243 = arith.addf %241, %242 : vector<8x128xf32>
    %244 = arith.negf %243 : vector<8x128xf32>
    %245 = math.exp %244 : vector<8x128xf32>
    %cst_40 = arith.constant 1.000000e+00 : f32
    %246 = vector.broadcast %cst_40 : f32 to vector<8x128xf32>
    %247 = arith.addf %246, %245 : vector<8x128xf32>
    %248 = arith.divf %246, %247 : vector<8x128xf32>
    %249 = math.tanh %243 : vector<8x128xf32>
    %250 = arith.select %14, %249, %248 : vector<8x128xi1>, vector<8x128xf32>
    %251 = vector.extract_strided_slice %250 {offsets = [0, 0], sizes = [8, 32], strides = [1, 1]} : vector<8x128xf32> to vector<8x32xf32>
    %252 = vector.extract_strided_slice %250 {offsets = [0, 32], sizes = [8, 32], strides = [1, 1]} : vector<8x128xf32> to vector<8x32xf32>
    %253 = vector.extract_strided_slice %250 {offsets = [0, 64], sizes = [8, 32], strides = [1, 1]} : vector<8x128xf32> to vector<8x32xf32>
    %254 = vector.extract_strided_slice %250 {offsets = [0, 96], sizes = [8, 32], strides = [1, 1]} : vector<8x128xf32> to vector<8x32xf32>
    %255 = arith.mulf %252, %238 : vector<8x32xf32>
    %256 = arith.mulf %251, %253 : vector<8x32xf32>
    %257 = arith.addf %255, %256 : vector<8x32xf32>
    %258 = math.tanh %257 : vector<8x32xf32>
    %259 = arith.mulf %254, %258 : vector<8x32xf32>
    %c0_41 = arith.constant 0 : index
    %260 = memref.load %arg1[%c0_41] : memref<4xi32, #tpu.memory_space<smem>>
    %c40_i32 = arith.constant 40 : i32
    %261 = arith.addi %c40_i32, %260 : i32
    %262 = arith.index_cast %261 : i32 to index
    %c0_42 = arith.constant 0 : index
    %263 = vector.load %arg5[%262, %c0_42] : memref<88x32xf32, #tpu.memory_space<vmem>>, vector<1x32xf32>
    %c1 = arith.constant 1 : index
    %264 = memref.load %arg1[%c1] : memref<4xi32, #tpu.memory_space<smem>>
    %c40_i32_43 = arith.constant 40 : i32
    %265 = arith.addi %c40_i32_43, %264 : i32
    %266 = arith.index_cast %265 : i32 to index
    %c0_44 = arith.constant 0 : index
    %267 = vector.load %arg5[%266, %c0_44] : memref<88x32xf32, #tpu.memory_space<vmem>>, vector<1x32xf32>
    %cst_45 = arith.constant 0.000000e+00 : f32
    %268 = vector.broadcast %cst_45 : f32 to vector<6x32xf32>
    %269 = tpu.concatenate %263, %267, %268 in 0 : vector<1x32xf32>, vector<1x32xf32>, vector<6x32xf32> -> vector<8x32xf32>
    %c2 = arith.constant 2 : index
    %270 = memref.load %arg1[%c2] : memref<4xi32, #tpu.memory_space<smem>>
    %c56_i32 = arith.constant 56 : i32
    %271 = arith.addi %c56_i32, %270 : i32
    %272 = arith.index_cast %271 : i32 to index
    %c0_46 = arith.constant 0 : index
    %273 = vector.load %arg5[%272, %c0_46] : memref<88x32xf32, #tpu.memory_space<vmem>>, vector<1x32xf32>
    %c3 = arith.constant 3 : index
    %274 = memref.load %arg1[%c3] : memref<4xi32, #tpu.memory_space<smem>>
    %c56_i32_47 = arith.constant 56 : i32
    %275 = arith.addi %c56_i32_47, %274 : i32
    %276 = arith.index_cast %275 : i32 to index
    %c0_48 = arith.constant 0 : index
    %277 = vector.load %arg5[%276, %c0_48] : memref<88x32xf32, #tpu.memory_space<vmem>>, vector<1x32xf32>
    %cst_49 = arith.constant 0.000000e+00 : f32
    %278 = vector.broadcast %cst_49 : f32 to vector<6x32xf32>
    %279 = tpu.concatenate %273, %277, %278 in 0 : vector<1x32xf32>, vector<1x32xf32>, vector<6x32xf32> -> vector<8x32xf32>
    %c0_50 = arith.constant 0 : index
    %c0_51 = arith.constant 0 : index
    %280 = vector.load %arg5[%c0_50, %c0_51] : memref<88x32xf32, #tpu.memory_space<vmem>>, vector<32x32xf32>
    %cst_52 = arith.constant dense<0.000000e+00> : vector<8x32xf32>
    %281 = tpu.matmul %259, %280, %cst_52 {dimension_numbers = #tpu.dot_dimension_numbers<[1], [0], [0], [1], [0, 0, 1, 1], [], []>} : vector<8x32xf32>, vector<32x32xf32>, vector<8x32xf32> -> vector<8x32xf32>
    %c0_53 = arith.constant 0 : index
    %c0_54 = arith.constant 0 : index
    %282 = vector.load %arg3[%c0_53, %c0_54] : memref<8x8xf32, #tpu.memory_space<vmem>>, vector<8x8xf32>
    %c32_55 = arith.constant 32 : index
    %c0_56 = arith.constant 0 : index
    %283 = vector.load %arg5[%c32_55, %c0_56] : memref<88x32xf32, #tpu.memory_space<vmem>>, vector<8x32xf32>
    %cst_57 = arith.constant dense<0.000000e+00> : vector<8x32xf32>
    %284 = tpu.matmul %282, %283, %cst_57 {dimension_numbers = #tpu.dot_dimension_numbers<[1], [0], [0], [1], [0, 0, 1, 1], [], []>} : vector<8x8xf32>, vector<8x32xf32>, vector<8x32xf32> -> vector<8x32xf32>
    %285 = arith.addf %281, %284 : vector<8x32xf32>
    %286 = arith.addf %285, %269 : vector<8x32xf32>
    %287 = arith.addf %286, %279 : vector<8x32xf32>
    %c64_58 = arith.constant 64 : index
    %c0_59 = arith.constant 0 : index
    %288 = vector.load %arg5[%c64_58, %c0_59] : memref<88x32xf32, #tpu.memory_space<vmem>>, vector<1x32xf32>
    %289 = vector.broadcast %288 : vector<1x32xf32> to vector<8x32xf32>
    %290 = arith.addf %287, %289 : vector<8x32xf32>
    %291 = arith.negf %290 : vector<8x32xf32>
    %292 = math.exp %291 : vector<8x32xf32>
    %cst_60 = arith.constant 1.000000e+00 : f32
    %293 = vector.broadcast %cst_60 : f32 to vector<8x32xf32>
    %294 = arith.addf %293, %292 : vector<8x32xf32>
    %295 = arith.divf %293, %294 : vector<8x32xf32>
    %296 = arith.mulf %290, %295 : vector<8x32xf32>
    %c65 = arith.constant 65 : index
    %c0_61 = arith.constant 0 : index
    %297 = vector.load %arg5[%c65, %c0_61] : memref<88x32xf32, #tpu.memory_space<vmem>>, vector<1x32xf32>
    %298 = vector.broadcast %297 : vector<1x32xf32> to vector<8x32xf32>
    %299 = arith.mulf %296, %298 : vector<8x32xf32>
    %cst_62 = arith.constant dense<0.000000e+00> : vector<8xf32>
    %300 = vector.multi_reduction <add>, %299, %cst_62 [1] : vector<8x32xf32> to vector<8xf32>
    %301 = vector.shape_cast %300 : vector<8xf32> to vector<8x1xf32>
    %c66 = arith.constant 66 : index
    %c0_63 = arith.constant 0 : index
    %302 = vector.load %arg5[%c66, %c0_63] : memref<88x32xf32, #tpu.memory_space<vmem>>, vector<1x1xf32>
    %303 = vector.broadcast %302 : vector<1x1xf32> to vector<8x1xf32>
    %304 = arith.addf %301, %303 : vector<8x1xf32>
    %c0_64 = arith.constant 0 : index
    %c0_65 = arith.constant 0 : index
    %305 = vector.load %arg6[%c0_64, %c0_65] : memref<8x1xf32, #tpu.memory_space<vmem>>, vector<8x1xf32>
    tpu.vector_store %arg6[%c0_64, %c0_65], %304 {strides = array<i32>} : memref<8x1xf32, #tpu.memory_space<vmem>>, vector<8x1xf32>,
    return
  }
  func.func @transform_0(%arg0: i32, %arg1: memref<4xi32, #tpu.memory_space<smem>>) -> (i32, i32) {
    %c0_i32 = arith.constant 0 : i32
    %c0_i32_0 = arith.constant 0 : i32
    %c0_i32_1 = arith.constant 0 : i32
    return %c0_i32, %c0_i32_0 : i32, i32
  }
  func.func @transform_1(%arg0: i32, %arg1: memref<4xi32, #tpu.memory_space<smem>>) -> (i32, i32) {
    %c0_i32 = arith.constant 0 : i32
    %c0_i32_0 = arith.constant 0 : i32
    %c0_i32_1 = arith.constant 0 : i32
    return %c0_i32, %c0_i32_0 : i32, i32
  }
  func.func @transform_2(%arg0: i32, %arg1: memref<4xi32, #tpu.memory_space<smem>>) -> (i32, i32) {
    %c0_i32 = arith.constant 0 : i32
    %c0_i32_0 = arith.constant 0 : i32
    %c0_i32_1 = arith.constant 0 : i32
    return %c0_i32, %c0_i32_0 : i32, i32
  }
  func.func @transform_3(%arg0: i32, %arg1: memref<4xi32, #tpu.memory_space<smem>>) -> (i32, i32) {
    %c0_i32 = arith.constant 0 : i32
    %c0_i32_0 = arith.constant 0 : i32
    %c0_i32_1 = arith.constant 0 : i32
    return %c0_i32, %c0_i32_0 : i32, i32
  }
  func.func @transform_4(%arg0: i32, %arg1: memref<4xi32, #tpu.memory_space<smem>>) -> (i32, i32) {
    %c0_i32 = arith.constant 0 : i32
    %c0_i32_0 = arith.constant 0 : i32
    %c0_i32_1 = arith.constant 0 : i32
    return %c0_i32, %c0_i32_0 : i32, i32
  }
}

</mosaic_0001>

<bundles_post_ra>
// kernel: forward.1
= control target key start
LH: loop header
LB: loop body
LE: loop exit
PB: predicated region body
PF: predicated region fallthrough
CT: control target
= control target key end

     0   :  { %s2861_s0 = inlined_call_operand.vmem [shape: s32[4], index: 0, kind: input, shape index: {}]   ;;  %s2862_s1 = inlined_call_operand.vmem [shape: f32[48,16], index: 1, kind: input, shape index: {}]   ;;  %s2863_s2 = inlined_call_operand.vmem [shape: f32[8,8], index: 2, kind: input, shape index: {}]   ;;  %s2864_s3 = inlined_call_operand.vmem [shape: f32[144,128], index: 3, kind: input, shape index: {}]   ;;  %s2865_s4 = inlined_call_operand.vmem [shape: f32[88,32], index: 4, kind: input, shape index: {}]   ;;  %s2866_s5 = inlined_call_operand.vmem [shape: f32[8,1], index: 5, kind: output, shape index: {}]  }
   0x1   :  { %s10_s20 = sshll.u32 %s2861_s0, 4  ;;  %s11_s20 = int_to_ptr.vmem [resolvable:$true] %s10_s20 }
   0x2   :  { %s2444_s21 = scalar_lea.vmem %s11_s20, 16  ;;  %p2449_p1 = scmp.lt.s32.totalorder %s11_s20, %s11_s20 }
   0x3   :  { %p2445_p0 = scmp.ne.s32.totalorder %s11_s20, %s2444_s21  ;;  %p2450_p2 = scmp.lt.s32.totalorder %s2444_s21, %s2444_s21 }
   0x5   :  { %p2451_p3 = por %p2450_p2, %p2449_p1 }
   0x7   :  { %p2452_p4 = pnand %p2451_p3, %p2445_p0 }
   0x9   :  { %2455 = shalt.err (!%p2452_p4)  }
   0xa   :  { %s2458_s22 = smov [#allocation3]  }
   0xb   :  { %13 = dma.vmem_to_smem %s11_s20, 16, %s2458_s22, [#allocation2] }
   0xc   :  { %2456 = dma.done.wait [#allocation2], 16 }
   0xd   :  { %2457 = vsyncadd [#allocation2], 4294967280 }
   0xe   :  { %15 = sfence }
   0xf   :  { %v30_v0 = vld [vmem:[%s2865_s4 + $0x48] sm:$0xff]  ;;  %v31_v1 = vld [vmem:[%s2865_s4 + $0x50] sm:$0xff]  ;;  %v24_v2 = vld [vmem:[%s2862_s1] sm:$0xff]  ;;  %vm32_vm0 = vcmask 130048   ;;  %v2459_v17 = vmov 0.0|0.0   ;;  %vm2460_vm1 = vmmov 0  }
  0x10   :  { %v2216_v3 = vpack.c.bf16 %v31_v1, %v30_v0  ;;  %2025 = vmatprep.mubr.msk.f32.mxu0 %vm32_vm0, %v24_v2  ;;  %v25_v4 = vld [vmem:[%s2862_s1 + $0x8] sm:$0xff]  ;;  %v26_v5 = vld [vmem:[%s2862_s1 + $0x10] sm:$0xff]  ;;  %v27_v6 = vld [vmem:[%s2862_s1 + $0x18] sm:$0xff]  ;;  %v2461_v22 = vmov 0.0   ;;  %vm202_vm2 = vcmask 261120   ;;  %s2462_s29 = smov 64  }
  0x11   :  { %v28_v7 = vld [vmem:[%s2862_s1 + $0x20] sm:$0xff]  ;;  %v29_v8 = vld [vmem:[%s2862_s1 + $0x28] sm:$0xff]  ;;  %v195_v15 = vld [vmem:[%s2864_s3 + $0x10] sm:$0xff]  ;;  %s2463_s30 = smov 32   ;;  %vm1672_vm6 = vcmask 64512   ;;  %s1918_s10 = sld [smem:[#allocation3 + $0x3]] }
  0x12   :  { %2217 = vmatprep.subr.bf16.mxu0 %v2216_v3  ;;  %v193_v9 = vld [vmem:[%s2864_s3] sm:$0xff]  ;;  %v194_v10 = vld [vmem:[%s2864_s3 + $0x8] sm:$0xff]  ;;  %v196_v16 = vld [vmem:[%s2864_s3 + $0x18] sm:$0xff]  ;;  %s1638_s11 = sld [smem:[#allocation3]]  ;;  %s1916_s12 = sld [smem:[#allocation3 + $0x2]]  ;;  %vm1649_vm7 = vcmask 1040384  }
  0x13   :  { %2219 = vmatpush3.bf16.msra.mxu0 %v2216_v3  ;;  %v2220_v11 = vpack.c.bf16 %v194_v10, %v193_v9  ;;  %v316_v12 = vld [vmem:[%s2864_s3 + $0x20] sm:$0xff]  ;;  %v317_v13 = vld [vmem:[%s2864_s3 + $0x28] sm:$0xff]  ;;  %v2224_v18 = vpack.c.bf16 %v196_v16, %v195_v15  ;;  %v318_v19 = vld [vmem:[%s2864_s3 + $0x30] sm:$0xff]  ;;  %vm1651_vm8 = vcmask 1041408   ;;  %vm1851_vm9 = vcmask 7168  }
  0x14   :  { %v2533_v14 = vpack.c.bf16 %v317_v13, %v316_v12  ;;  %2228 = vmatprep.subr.bf16.mxu0 %v2459_v17  ;;  %v319_v20 = vld [vmem:[%s2864_s3 + $0x38] sm:$0xff]  ;;  %v2579_v61 = vld [vmem:[%s2864_s3 + $0x40] ss:$0 sm:$0xff] }
  0x15   :  { %2221 = vmatprep.subr.bf16.mxu1 %v2220_v11  ;;  %v2550_v21 = vpack.c.bf16 %v319_v20, %v318_v19  ;;  %v1666_v9 = vld [vmem:[%s2865_s4] sm:$0xff] }
  0x16   :  { %2026 = vmatmul.mubr.msk.f32.vlgmr.msra.gmra.mrb[0].mxu0 %vm32_vm0, %v25_v4  ;;  %2223 = vmatpush3.bf16.msra.mxu1 %v2220_v11  ;;  %v188_v4 = vlaneseq }
  0x17   :  { %2028 = vmatprep.mubr.msk.f32.mxu0 %vm32_vm0, %v26_v5  ;;  %2230 = vmatpush3.bf16.msra.mxu0 %v2533_v14 }
  0x18   :  { %2225 = vmatprep.subr.bf16.mxu1 %v2224_v18  ;;  %2231 = vmatprep.subr.bf16.mxu0 %v2459_v17  ;;  %s1857_s19 = scalar_lea.vmem %s2865_s4, %s1638_s11  ;;  %s1861_s21 = scalar_lea.vmem %s2865_s4, %s1916_s12 }
  0x1a   :  { %2029 = vmatmul.mubr.msk.f32.gmra.mrb[2].mxu0 %vm32_vm0, %v27_v6  ;;  %2227 = vmatpush3.bf16.msra.mxu1 %v2224_v18  ;;  %v189_v6 = vand.u32 127, %v188_v4 }
  0x1b   :  { %2031 = vmatprep.mubr.msk.f32.mxu0 %vm32_vm0, %v28_v7  ;;  %2234 = vmatprep.subr.bf16.mxu1 %v2459_v17 }
  0x1c   :  { %2233 = vmatpush3.bf16.msra.mxu0 %v2550_v21  ;;  %vm190_vm3 = vcmp.ge.s32.totalorder %v189_v6, 64  ;;  %vm191_vm4 = vcmp.lt.s32.totalorder %v189_v6, 96 }
  0x1d   :  { %2240 = vmatprep.subr.bf16.mxu0 %v2459_v17  ;;  %vm2586_vm5 = vmand %vm190_vm3, %vm191_vm4 }
  0x1e   :  { %2032 = vmatmul.mubr.msk.f32.gmra.mrb[4].mxu0 %vm32_vm0, %v29_v8 }
  0x1f   :  { %2059 = vmatprep.mubr.msk.f32.mxu0 %vm2460_vm1, %v2461_v22 }
  0x22   :  { %2060 = vmatmul.mubr.f32.vlgmr.msra.gmra.mrb[6].mxu0 %v2461_v22 }
  0x23   :  { %2242 = vmatpush3.bf16.msra.mxu0 %v2533_v14  ;;  %2081 = vmatprep.mubr.msk.f32.mxu0 %vm2460_vm1, %v2461_v22 }
  0x24   :  { %2243 = vmatprep.subr.bf16.mxu0 %v2459_v17 }
  0x27   :  { %2245 = vmatpush3.bf16.msra.mxu0 %v2550_v21 }
  0x28   :  { %2252 = vmatprep.subr.bf16.mxu0 %v2459_v17 }
  0xe9   :  { %v2027_v23 = vpop.f32.mrb[0].mxu0 }
  0xea   :  { %v1872_v24 = vmul.f32 -1.442695, %v2027_v23  ;;  %v117_v25 = vpop.f32.mrb[1].mxu0 }
  0xeb   :  { %v1871_v26 = vmul.f32 -1.442695, %v117_v25 }
  0xec   :  { %2320 = vpow2.f32 %v1872_v24 }
  0xed   :  { %2322 = vpow2.f32 %v1871_v26  ;;  %v2030_v27 = vpop.f32.mrb[2].mxu0 }
  0xee   :  { %v1874_v28 = vmul.f32 -1.442695, %v2030_v27  ;;  %v127_v29 = vpop.f32.mrb[3].mxu0 }
  0xef   :  { %v1873_v30 = vmul.f32 -1.442695, %v127_v29 }
  0xf0   :  { %2324 = vpow2.f32 %v1874_v28 }
  0xf1   :  { %2326 = vpow2.f32 %v1873_v30  ;;  %v2033_v47 = vpop.f32.mrb[4].mxu0 }
  0xf2   :  { %v1876_v48 = vmul.f32 -1.442695, %v2033_v47  ;;  %v137_v49 = vpop.f32.mrb[5].mxu0 }
  0xf3   :  { %v1875_v50 = vmul.f32 -1.442695, %v137_v49 }
  0xf5   :  { %v389_v59 = vpop.f32.mrb[6].mxu0 }
  0xf6   :  { %v2321_v31 = vpop.eup %2320  ;;  %v2061_v60 = vpop.f32.mrb[7].mxu0 }
  0xf7   :  { %v2323_v32 = vpop.eup %2322  ;;  %v165_v33 = vadd.f32 1.0, %v2321_v31 }
  0xf8   :  { %v164_v34 = vadd.f32 1.0, %v2323_v32 }
  0xf9   :  { %2328 = vrcp.f32 %v165_v33 }
  0xfa   :  { %v2325_v35 = vpop.eup %2324  ;;  %2330 = vrcp.f32 %v164_v34 }
  0xfb   :  { %v2327_v36 = vpop.eup %2326  ;;  %v167_v37 = vadd.f32 1.0, %v2325_v35 }
  0xfc   :  { %v166_v38 = vadd.f32 1.0, %v2327_v36 }
  0xfd   :  { %2332 = vrcp.f32 %v167_v37 }
  0xfe   :  { %2334 = vrcp.f32 %v166_v38 }
  0xff   :  { %2336 = vpow2.f32 %v1876_v48 }
 0x100   :  { %2338 = vpow2.f32 %v1875_v50 }
 0x103   :  { %v2329_v39 = vpop.eup %2328 }
 0x104   :  { %v2331_v40 = vpop.eup %2330  ;;  %v183_v42 = vmul.f32 %v2329_v39, %v2027_v23 }
 0x105   :  { %v182_v41 = vmul.f32 %v2331_v40, %v117_v25 }
 0x107   :  { %v2333_v43 = vpop.eup %2332  ;;  %2042 = vmatprep.mubr.msk.f32.mxu1 %vm202_vm2, %v182_v41 }
 0x108   :  { %v2335_v44 = vpop.eup %2334  ;;  %2043 = vmatmul.mubr.msk.f32.vlgmr.msra.gmra.mrb[0].mxu1 %vm202_vm2, %v183_v42  ;;  %v185_v45 = vmul.f32 %v2333_v43, %v2030_v27 }
 0x109   :  { %v184_v46 = vmul.f32 %v2335_v44, %v127_v29  ;;  %2236 = vmatpush3.bf16.msra.mxu1 %v2533_v14  ;;  %v2337_v51 = vpop.eup %2336 }
 0x10a   :  { %2237 = vmatprep.subr.bf16.mxu1 %v2459_v17  ;;  %v2339_v52 = vpop.eup %2338  ;;  %v169_v53 = vadd.f32 1.0, %v2337_v51 }
 0x10b   :  { %2045 = vmatprep.mubr.msk.f32.mxu1 %vm202_vm2, %v184_v46  ;;  %v168_v54 = vadd.f32 1.0, %v2339_v52 }
 0x10c   :  { %2046 = vmatmul.mubr.msk.f32.gmra.mrb[2].mxu1 %vm202_vm2, %v185_v45  ;;  %2340 = vrcp.f32 %v169_v53 }
 0x10d   :  { %2239 = vmatpush3.bf16.msra.mxu1 %v2550_v21  ;;  %2342 = vrcp.f32 %v168_v54 }
 0x10e   :  { %2246 = vmatprep.subr.bf16.mxu1 %v2459_v17 }
 0x116   :  { %v2341_v55 = vpop.eup %2340 }
 0x117   :  { %v2343_v56 = vpop.eup %2342  ;;  %v187_v57 = vmul.f32 %v2341_v55, %v2033_v47 }
 0x118   :  { %v186_v58 = vmul.f32 %v2343_v56, %v137_v49 }
 0x11a   :  { %2048 = vmatprep.mubr.msk.f32.mxu1 %vm202_vm2, %v186_v58 }
 0x11b   :  { %2049 = vmatmul.mubr.msk.f32.gmra.mrb[4].mxu1 %vm202_vm2, %v187_v57 }
 0x11c   :  { %2070 = vmatprep.mubr.msk.f32.mxu1 %vm2460_vm1, %v2461_v22 }
 0x1db   :  { %v2044_v62 = vpop.f32.mrb[0].mxu1 }
 0x1dc   :  { %v287_v63 = vpop.f32.mrb[1].mxu1  ;;  %v293_v28 = vadd.f32 %v2044_v62, %v2579_v61 }
 0x1dd   :  { %v288_v0 = vadd.f32 %v2579_v61, %v287_v63 }
 0x1df   :  { %v393_v1 = vadd.f32 %v389_v59, %v288_v0  ;;  %v2582_v7 = vpop.f32.mrb[2].mxu1 }
 0x1e0   :  { %v2584_v8 = vpop.f32.mrb[3].mxu1 }
 0x1e1   :  { %v1884_v2 = vmul.f32 -1.442695, %v393_v1  ;;  %v298_v47 = vadd.f32 %v2579_v61, %v2584_v8 }
 0x1e3   :  { %2344 = vpow2.f32 %v1884_v2 }
 0x1e4   :  { %2346 = vtanh.f32 %v393_v1 }
 0x1ed   :  { %v2345_v3 = vpop.eup %2344 }
 0x1ee   :  { %v397_v5 = vadd.f32 1.0, %v2345_v3  ;;  %v2347_v10 = vpop.eup %2346  ;;  %v2593_v13 = vpop.f32.mrb[4].mxu1  ;;  %v303_v3 = vadd.f32 %v2582_v7, %v2579_v61 }
 0x1ef   :  { %v2595_v15 = vpop.f32.mrb[5].mxu1 }
 0x1f0   :  { %2348 = vrcp.f32 %v397_v5 }
 0x1fa   :  { %v2349_v11 = vpop.eup %2348 }
 0x1fb   :  { %v401_v12 = vsel %vm2586_vm5, %v2347_v10, %v2349_v11 }
 0x1fc   :  { %404 = vrot.lane.b32.xlu0 %v401_v12, %s2462_s29  ;;  %v402_v19 = vmul.f32 0.0, %v401_v12 }
 0x26e   :  { %v405_v16 = vpop.permute.xlu0 %404 }
 0x26f   :  { %v407_v18 = vmul.f32 %v405_v16, %v401_v12 }
 0x271   :  { %409 = vrot.lane.b32.xlu0 %v407_v18, %s2463_s30 }
 0x2e3   :  { %v410_v20 = vpop.permute.xlu0 %409 }
 0x2e4   :  { %v412_v23 = vadd.f32 %v410_v20, %v402_v19 }
 0x2e6   :  { %2350 = vtanh.f32 %v412_v23 }
 0x2f0   :  { %v2351_v24 = vpop.eup %2350 }
 0x2f1   :  { %415 = vrot.lane.b32.xlu1 %v2351_v24, %s2462_s29  ;;  %v925_v24 = vld [vmem:[%s2864_s3 + $0x50] sm:$0xff] }
 0x363   :  { %v416_v25 = vpop.permute.xlu1 %415 }
 0x364   :  { %v418_v26 = vmul.f32 %v416_v25, %v401_v12 }
 0x366   :  { %420 = vrot.lane.b32.xlu1 %v418_v26, %s2463_s30 }
 0x3d8   :  { %v2600_v27 = vpop.permute.xlu1 %420 }
 0x3d9   :  { %2071 = vmatmul.mubr.msk.f32.vlgmr.msra.gmra.mrb[6].mxu1 %vm202_vm2, %v2600_v27 }
 0x3da   :  { %2248 = vmatpush3.bf16.msra.mxu1 %v2533_v14  ;;  %2092 = vmatprep.mubr.msk.f32.mxu1 %vm2460_vm1, %v2461_v22 }
 0x3db   :  { %2249 = vmatprep.subr.bf16.mxu1 %v2459_v17 }
 0x3de   :  { %2251 = vmatpush3.bf16.msra.mxu1 %v2550_v21 }
 0x3df   :  { %2258 = vmatprep.subr.bf16.mxu1 %v2459_v17 }
 0x4ac   :  { %v490_v29 = vpop.f32.mrb[6].mxu1 }
 0x4ad   :  { %v494_v30 = vadd.f32 %v490_v29, %v293_v28  ;;  %v2072_v31 = vpop.f32.mrb[7].mxu1 }
 0x4ae   :  { %v927_v31 = vld [vmem:[%s2864_s3 + $0x60] sm:$0xff] }
 0x4af   :  { %v1886_v32 = vmul.f32 -1.442695, %v494_v30 }
 0x4b1   :  { %2352 = vpow2.f32 %v1886_v32 }
 0x4b2   :  { %2354 = vtanh.f32 %v494_v30  ;;  %v926_v30 = vld [vmem:[%s2864_s3 + $0x58] sm:$0xff] }
 0x4b3   :  { %v2268_v32 = vpack.c.bf16 %v927_v31, %v926_v30 }
 0x4bb   :  { %v2353_v33 = vpop.eup %2352 }
 0x4bc   :  { %v498_v34 = vadd.f32 1.0, %v2353_v33  ;;  %v2355_v35 = vpop.eup %2354 }
 0x4be   :  { %2356 = vrcp.f32 %v498_v34  ;;  %v308_v34 = vadd.f32 %v2579_v61, %v2595_v15 }
 0x4c8   :  { %v2357_v36 = vpop.eup %2356 }
 0x4c9   :  { %v502_v37 = vsel %vm2586_vm5, %v2355_v35, %v2357_v36 }
 0x4ca   :  { %505 = vrot.lane.b32.xlu0 %v502_v37, %s2462_s29  ;;  %v503_v40 = vmul.f32 %v502_v37, %v412_v23  ;;  %v924_v23 = vld [vmem:[%s2864_s3 + $0x48] sm:$0xff] }
 0x4cb   :  { %v2264_v25 = vpack.c.bf16 %v925_v24, %v924_v23 }
 0x53c   :  { %v506_v38 = vpop.permute.xlu0 %505 }
 0x53d   :  { %v508_v39 = vmul.f32 %v506_v38, %v502_v37 }
 0x53f   :  { %510 = vrot.lane.b32.xlu1 %v508_v39, %s2463_s30 }
 0x5b1   :  { %v511_v41 = vpop.permute.xlu1 %510 }
 0x5b2   :  { %v513_v42 = vadd.f32 %v511_v41, %v503_v40 }
 0x5b4   :  { %2358 = vtanh.f32 %v513_v42 }
 0x5be   :  { %v2359_v43 = vpop.eup %2358 }
 0x5bf   :  { %516 = vrot.lane.b32.xlu0 %v2359_v43, %s2462_s29 }
 0x631   :  { %v517_v44 = vpop.permute.xlu0 %516 }
 0x632   :  { %v519_v45 = vmul.f32 %v517_v44, %v502_v37 }
 0x634   :  { %521 = vrot.lane.b32.xlu1 %v519_v45, %s2463_s30 }
 0x6a6   :  { %v2617_v46 = vpop.permute.xlu1 %521 }
 0x6a7   :  { %2082 = vmatmul.mubr.msk.f32.vlgmr.msra.gmra.mrb[8].mxu0 %vm202_vm2, %v2617_v46 }
 0x6a8   :  { %2254 = vmatpush3.bf16.msra.mxu0 %v2533_v14  ;;  %2103 = vmatprep.mubr.msk.f32.mxu0 %vm2460_vm1, %v2461_v22 }
 0x6a9   :  { %2255 = vmatprep.subr.bf16.mxu0 %v2459_v17 }
 0x6ac   :  { %2257 = vmatpush3.bf16.msra.mxu0 %v2550_v21 }
 0x6ad   :  { %2265 = vmatprep.subr.bf16.mxu0 %v2264_v25 }
 0x77a   :  { %v591_v48 = vpop.f32.mrb[8].mxu0 }
 0x77b   :  { %v595_v49 = vadd.f32 %v591_v48, %v298_v47  ;;  %v2083_v50 = vpop.f32.mrb[9].mxu0 }
 0x77d   :  { %v1888_v51 = vmul.f32 -1.442695, %v595_v49 }
 0x77f   :  { %2360 = vpow2.f32 %v1888_v51 }
 0x780   :  { %2362 = vtanh.f32 %v595_v49 }
 0x789   :  { %v2361_v52 = vpop.eup %2360 }
 0x78a   :  { %v599_v53 = vadd.f32 1.0, %v2361_v52  ;;  %v2363_v54 = vpop.eup %2362  ;;  %v1033_v52 = vld [vmem:[%s2864_s3 + $0x68] sm:$0xff] }
 0x78c   :  { %2364 = vrcp.f32 %v599_v53  ;;  %v1034_v53 = vld [vmem:[%s2864_s3 + $0x70] sm:$0xff] }
 0x796   :  { %v2365_v55 = vpop.eup %2364 }
 0x797   :  { %v603_v56 = vsel %vm2586_vm5, %v2363_v54, %v2365_v55  ;;  %v2691_v54 = vpack.c.bf16 %v1034_v53, %v1033_v52  ;;  %v1035_v55 = vld [vmem:[%s2864_s3 + $0x78] sm:$0xff] }
 0x798   :  { %606 = vrot.lane.b32.xlu0 %v603_v56, %s2462_s29  ;;  %v604_v59 = vmul.f32 %v603_v56, %v513_v42 }
 0x80a   :  { %v607_v57 = vpop.permute.xlu0 %606 }
 0x80b   :  { %v609_v58 = vmul.f32 %v607_v57, %v603_v56 }
 0x80d   :  { %611 = vrot.lane.b32.xlu1 %v609_v58, %s2463_s30 }
 0x87f   :  { %v612_v60 = vpop.permute.xlu1 %611 }
 0x880   :  { %v614_v62 = vadd.f32 %v612_v60, %v604_v59 }
 0x882   :  { %2366 = vtanh.f32 %v614_v62 }
 0x88c   :  { %v2367_v63 = vpop.eup %2366 }
 0x88d   :  { %617 = vrot.lane.b32.xlu0 %v2367_v63, %s2462_s29 }
 0x8ff   :  { %v618_v0 = vpop.permute.xlu0 %617 }
 0x900   :  { %v620_v1 = vmul.f32 %v618_v0, %v603_v56  ;;  %v1036_v56 = vld [vmem:[%s2864_s3 + $0x80] sm:$0xff] }
 0x901   :  { %v2701_v57 = vpack.c.bf16 %v1036_v56, %v1035_v55 }
 0x902   :  { %622 = vrot.lane.b32.xlu1 %v620_v1, %s2463_s30 }
 0x974   :  { %v623_v2 = vpop.permute.xlu1 %622 }
 0x975   :  { %2093 = vmatmul.mubr.msk.f32.vlgmr.msra.gmra.mrb[8].mxu1 %vm202_vm2, %v623_v2 }
 0x976   :  { %2260 = vmatpush3.bf16.msra.mxu1 %v2533_v14  ;;  %2114 = vmatprep.mubr.msk.f32.mxu1 %vm2460_vm1, %v2461_v22 }
 0x977   :  { %2261 = vmatprep.subr.bf16.mxu1 %v2459_v17 }
 0x97a   :  { %2263 = vmatpush3.bf16.msra.mxu1 %v2550_v21 }
 0x97b   :  { %2272 = vmatprep.subr.bf16.mxu1 %v2459_v17 }
 0xa48   :  { %v692_v4 = vpop.f32.mrb[8].mxu1 }
 0xa49   :  { %v696_v5 = vadd.f32 %v692_v4, %v303_v3  ;;  %v2094_v6 = vpop.f32.mrb[9].mxu1  ;;  %v2726_v3 = vld [vmem:[%s2864_s3 + $0x88] ss:$0 sm:$0xff] }
 0xa4b   :  { %v1890_v8 = vmul.f32 -1.442695, %v696_v5 }
 0xa4d   :  { %2368 = vpow2.f32 %v1890_v8 }
 0xa4e   :  { %2370 = vtanh.f32 %v696_v5 }
 0xa57   :  { %v2369_v10 = vpop.eup %2368 }
 0xa58   :  { %v700_v11 = vadd.f32 1.0, %v2369_v10  ;;  %v2371_v14 = vpop.eup %2370 }
 0xa5a   :  { %2372 = vrcp.f32 %v700_v11 }
 0xa64   :  { %v2373_v12 = vpop.eup %2372 }
 0xa65   :  { %v704_v16 = vsel %vm2586_vm5, %v2371_v14, %v2373_v12 }
 0xa66   :  { %707 = vrot.lane.b32.xlu0 %v704_v16, %s2462_s29  ;;  %v705_v7 = vmul.f32 %v704_v16, %v614_v62  ;;  %v313_v62 = vadd.f32 %v2593_v13, %v2579_v61 }
 0xad8   :  { %v708_v21 = vpop.permute.xlu0 %707 }
 0xad9   :  { %v710_v18 = vmul.f32 %v708_v21, %v704_v16 }
 0xadb   :  { %712 = vrot.lane.b32.xlu1 %v710_v18, %s2463_s30 }
 0xb4d   :  { %v713_v19 = vpop.permute.xlu1 %712 }
 0xb4e   :  { %v715_v20 = vadd.f32 %v713_v19, %v705_v7 }
 0xb50   :  { %2374 = vtanh.f32 %v715_v20 }
 0xb5a   :  { %v2375_v26 = vpop.eup %2374 }
 0xb5b   :  { %718 = vrot.lane.b32.xlu0 %v2375_v26, %s2462_s29 }
 0xbcd   :  { %v719_v28 = vpop.permute.xlu0 %718 }
 0xbce   :  { %v721_v29 = vmul.f32 %v719_v28, %v704_v16 }
 0xbd0   :  { %723 = vrot.lane.b32.xlu1 %v721_v29, %s2463_s30 }
 0xc42   :  { %v724_v33 = vpop.permute.xlu1 %723 }
 0xc43   :  { %2104 = vmatmul.mubr.msk.f32.vlgmr.msra.gmra.mrb[10].mxu0 %vm202_vm2, %v724_v33 }
 0xc44   :  { %2267 = vmatpush3.bf16.msra.mxu0 %v2264_v25  ;;  %2125 = vmatprep.mubr.msk.f32.mxu0 %vm202_vm2, %v2600_v27 }
 0xc45   :  { %2269 = vmatprep.subr.bf16.mxu0 %v2268_v32 }
 0xc48   :  { %2271 = vmatpush3.bf16.msra.mxu0 %v2268_v32 }
 0xc49   :  { %2278 = vmatprep.subr.bf16.mxu0 %v2459_v17 }
 0xc4b   :  { %2126 = vmatmul.mubr.msk.f32.vlgmr.msra.gmra.mrb[12].mxu0 %vm202_vm2, %v2617_v46 }
 0xc4c   :  { %2128 = vmatprep.mubr.msk.f32.mxu0 %vm202_vm2, %v623_v2  ;;  %2280 = vmatpush3.bf16.msra.mxu0 %v2691_v54 }
 0xc4d   :  { %2281 = vmatprep.subr.bf16.mxu0 %v2459_v17 }
 0xc4f   :  { %2129 = vmatmul.mubr.msk.f32.gmra.mrb[14].mxu0 %vm202_vm2, %v724_v33 }
 0xc50   :  { %2283 = vmatpush3.bf16.msra.mxu0 %v2701_v57 }
 0xc51   :  { %2290 = vmatprep.subr.bf16.mxu0 %v2459_v17 }
 0xd16   :  { %v793_v35 = vpop.f32.mrb[10].mxu0 }
 0xd17   :  { %v797_v36 = vadd.f32 %v793_v35, %v308_v34  ;;  %v2105_v37 = vpop.f32.mrb[11].mxu0 }
 0xd19   :  { %v1892_v38 = vmul.f32 -1.442695, %v797_v36 }
 0xd1b   :  { %2376 = vpow2.f32 %v1892_v38 }
 0xd1c   :  { %2378 = vtanh.f32 %v797_v36 }
 0xd1e   :  { %v2671_v27 = vpop.f32.mrb[12].mxu0 }
 0xd1f   :  { %v1004_v39 = vpop.f32.mrb[13].mxu0 }
 0xd20   :  { %v1005_v4 = vadd.f32 %v2726_v3, %v1004_v39 }
 0xd22   :  { %v2673_v40 = vpop.f32.mrb[14].mxu0 }
 0xd23   :  { %v2675_v41 = vpop.f32.mrb[15].mxu0 }
 0xd25   :  { %v2377_v42 = vpop.eup %2376 }
 0xd26   :  { %v801_v43 = vadd.f32 1.0, %v2377_v42  ;;  %v2379_v44 = vpop.eup %2378 }
 0xd28   :  { %2380 = vrcp.f32 %v801_v43 }
 0xd32   :  { %v2381_v45 = vpop.eup %2380 }
 0xd33   :  { %v805_v15 = vsel %vm2586_vm5, %v2379_v44, %v2381_v45  ;;  %v1010_v45 = vadd.f32 %v2671_v27, %v2726_v3 }
 0xd34   :  { %808 = vrot.lane.b32.xlu0 %v805_v15, %s2462_s29  ;;  %v806_v48 = vmul.f32 %v805_v15, %v715_v20 }
 0xda6   :  { %v809_v46 = vpop.permute.xlu0 %808 }
 0xda7   :  { %v811_v47 = vmul.f32 %v809_v46, %v805_v15 }
 0xda9   :  { %813 = vrot.lane.b32.xlu1 %v811_v47, %s2463_s30 }
 0xe1b   :  { %v814_v49 = vpop.permute.xlu1 %813 }
 0xe1c   :  { %v2681_v50 = vadd.f32 %v814_v49, %v806_v48 }
 0xe1e   :  { %2382 = vtanh.f32 %v2681_v50 }
 0xe28   :  { %v2383_v51 = vpop.eup %2382 }
 0xe29   :  { %819 = vrot.lane.b32.xlu0 %v2383_v51, %s2462_s29 }
 0xe9b   :  { %v820_v58 = vpop.permute.xlu0 %819 }
 0xe9c   :  { %v822_v59 = vmul.f32 %v820_v58, %v805_v15 }
 0xe9e   :  { %824 = vrot.lane.b32.xlu1 %v822_v59, %s2463_s30 }
 0xf10   :  { %v825_v60 = vpop.permute.xlu1 %824 }
 0xf11   :  { %2115 = vmatmul.mubr.msk.f32.vlgmr.msra.gmra.mrb[10].mxu1 %vm202_vm2, %v825_v60  ;;  %2131 = vmatprep.mubr.msk.f32.mxu0 %vm202_vm2, %v825_v60 }
 0xf12   :  { %2274 = vmatpush3.bf16.msra.mxu1 %v2691_v54  ;;  %2142 = vmatprep.mubr.msk.f32.mxu1 %vm2460_vm1, %v2461_v22 }
 0xf13   :  { %2275 = vmatprep.subr.bf16.mxu1 %v2459_v17 }
 0xf16   :  { %2277 = vmatpush3.bf16.msra.mxu1 %v2701_v57 }
 0xf17   :  { %2284 = vmatprep.subr.bf16.mxu1 %v2459_v17 }
 0xf19   :  { %2143 = vmatmul.mubr.f32.vlgmr.msra.gmra.mrb[12].mxu1 %v2461_v22 }
 0xf1a   :  { %2286 = vmatpush3.bf16.msra.mxu1 %v2691_v54  ;;  %2164 = vmatprep.mubr.msk.f32.mxu1 %vm2460_vm1, %v2461_v22 }
 0xf1b   :  { %2287 = vmatprep.subr.bf16.mxu1 %v2459_v17 }
 0xf1e   :  { %2289 = vmatpush3.bf16.msra.mxu1 %v2701_v57 }
 0xf1f   :  { %2296 = vmatprep.subr.bf16.mxu1 %v2459_v17 }
 0xfe4   :  { %v894_v63 = vpop.f32.mrb[10].mxu1 }
 0xfe5   :  { %v898_v0 = vadd.f32 %v894_v63, %v313_v62  ;;  %v2116_v1 = vpop.f32.mrb[11].mxu1 }
 0xfe6   :  { %v1015_v1 = vadd.f32 %v2726_v3, %v2675_v41 }
 0xfe7   :  { %v1894_v2 = vmul.f32 -1.442695, %v898_v0 }
 0xfe9   :  { %2384 = vpow2.f32 %v1894_v2 }
 0xfec   :  { %v1103_v5 = vpop.f32.mrb[12].mxu1 }
 0xfed   :  { %v1107_v6 = vadd.f32 %v1103_v5, %v1005_v4  ;;  %v2144_v8 = vpop.f32.mrb[13].mxu1 }
 0xfef   :  { %v1902_v10 = vmul.f32 -1.442695, %v1107_v6 }
 0xff1   :  { %2386 = vpow2.f32 %v1902_v10 }
 0xff2   :  { %2388 = vtanh.f32 %v898_v0 }
 0xff3   :  { %v2385_v11 = vpop.eup %2384 }
 0xff4   :  { %v902_v14 = vadd.f32 1.0, %v2385_v11 }
 0xff6   :  { %2390 = vrcp.f32 %v902_v14 }
 0xff7   :  { %2392 = vtanh.f32 %v1107_v6 }
 0xffb   :  { %v2387_v61 = vpop.eup %2386 }
 0xffc   :  { %v1111_v13 = vadd.f32 1.0, %v2387_v61  ;;  %v2389_v12 = vpop.eup %2388 }
 0xffe   :  { %2394 = vrcp.f32 %v1111_v13 }
0x1000   :  { %v2391_v16 = vpop.eup %2390 }
0x1001   :  { %v906_v21 = vsel %vm2586_vm5, %v2389_v12, %v2391_v16  ;;  %v2393_v18 = vpop.eup %2392 }
0x1002   :  { %909 = vrot.lane.b32.xlu0 %v906_v21, %s2462_s29  ;;  %v907_v26 = vmul.f32 %v906_v21, %v2681_v50 }
0x1008   :  { %v2395_v7 = vpop.eup %2394 }
0x1009   :  { %v1115_v19 = vsel %vm2586_vm5, %v2393_v18, %v2395_v7 }
0x100a   :  { %1118 = vrot.lane.b32.xlu1 %v1115_v19, %s2462_s29  ;;  %v1116_v30 = vmul.f32 0.0, %v1115_v19 }
0x1074   :  { %v910_v20 = vpop.permute.xlu0 %909 }
0x1075   :  { %v912_v23 = vmul.f32 %v910_v20, %v906_v21 }
0x1077   :  { %914 = vrot.lane.b32.xlu0 %v912_v23, %s2463_s30  ;;  %v1020_v23 = vadd.f32 %v2673_v40, %v2726_v3 }
0x107c   :  { %v1119_v24 = vpop.permute.xlu1 %1118 }
0x107d   :  { %v1121_v25 = vmul.f32 %v1119_v24, %v1115_v19 }
0x107f   :  { %1123 = vrot.lane.b32.xlu1 %v1121_v25, %s2463_s30 }
0x10e9   :  { %v915_v28 = vpop.permute.xlu0 %914 }
0x10ea   :  { %v917_v29 = vadd.f32 %v915_v28, %v907_v26 }
0x10ec   :  { %2396 = vtanh.f32 %v917_v29 }
0x10f1   :  { %v1124_v31 = vpop.permute.xlu1 %1123 }
0x10f2   :  { %v1126_v32 = vadd.f32 %v1124_v31, %v1116_v30 }
0x10f4   :  { %2398 = vtanh.f32 %v1126_v32 }
0x10f6   :  { %v2397_v33 = vpop.eup %2396 }
0x10f7   :  { %920 = vrot.lane.b32.xlu0 %v2397_v33, %s2462_s29 }
0x10fe   :  { %v2399_v34 = vpop.eup %2398 }
0x10ff   :  { %1129 = vrot.lane.b32.xlu1 %v2399_v34, %s2462_s29 }
0x1169   :  { %v921_v35 = vpop.permute.xlu0 %920 }
0x116a   :  { %v923_v36 = vmul.f32 %v921_v35, %v906_v21 }
0x116c   :  { %934 = vrot.lane.b32.xlu0 %v923_v36, %s2463_s30 }
0x1171   :  { %v1130_v37 = vpop.permute.xlu1 %1129 }
0x1172   :  { %v1132_v38 = vmul.f32 %v1130_v37, %v1115_v19 }
0x1174   :  { %1134 = vrot.lane.b32.xlu1 %v1132_v38, %s2463_s30 }
0x11de   :  { %v935_v39 = vpop.permute.xlu0 %934 }
0x11df   :  { %2132 = vmatmul.mubr.msk.f32.gmra.mrb[16].mxu0 %vm202_vm2, %v935_v39 }
0x11e0   :  { %2153 = vmatprep.mubr.msk.f32.mxu0 %vm2460_vm1, %v2461_v22 }
0x11e6   :  { %v1135_v42 = vpop.permute.xlu1 %1134 }
0x11e7   :  { %2154 = vmatmul.mubr.msk.f32.vlgmr.msra.gmra.mrb[18].mxu0 %vm202_vm2, %v1135_v42 }
0x11e8   :  { %2292 = vmatpush3.bf16.msra.mxu0 %v2691_v54  ;;  %2175 = vmatprep.mubr.msk.f32.mxu0 %vm2460_vm1, %v2461_v22 }
0x11e9   :  { %2293 = vmatprep.subr.bf16.mxu0 %v2459_v17 }
0x11ec   :  { %2295 = vmatpush3.bf16.msra.mxu0 %v2701_v57 }
0x11ed   :  { %2302 = vmatprep.subr.bf16.mxu0 %v2459_v17 }
0x12b2   :  { %v2752_v43 = vpop.f32.mrb[16].mxu0 }
0x12b3   :  { %v2754_v44 = vpop.f32.mrb[17].mxu0 }
0x12b4   :  { %v1025_v42 = vadd.f32 %v2726_v3, %v2754_v44 }
0x12ba   :  { %v1204_v15 = vpop.f32.mrb[18].mxu0 }
0x12bb   :  { %v1208_v46 = vadd.f32 %v1204_v15, %v1010_v45  ;;  %v2155_v47 = vpop.f32.mrb[19].mxu0 }
0x12bd   :  { %v1904_v48 = vmul.f32 -1.442695, %v1208_v46 }
0x12bf   :  { %2400 = vpow2.f32 %v1904_v48 }
0x12c0   :  { %2402 = vtanh.f32 %v1208_v46 }
0x12c9   :  { %v2401_v49 = vpop.eup %2400 }
0x12ca   :  { %v1212_v50 = vadd.f32 1.0, %v2401_v49  ;;  %v2403_v51 = vpop.eup %2402 }
0x12cc   :  { %2404 = vrcp.f32 %v1212_v50 }
0x12d6   :  { %v2405_v52 = vpop.eup %2404 }
0x12d7   :  { %v1216_v53 = vsel %vm2586_vm5, %v2403_v51, %v2405_v52 }
0x12d8   :  { %1219 = vrot.lane.b32.xlu0 %v1216_v53, %s2462_s29  ;;  %v1217_v27 = vmul.f32 %v1216_v53, %v1126_v32 }
0x134a   :  { %v1220_v55 = vpop.permute.xlu0 %1219 }
0x134b   :  { %v1222_v56 = vmul.f32 %v1220_v55, %v1216_v53 }
0x134d   :  { %1224 = vrot.lane.b32.xlu1 %v1222_v56, %s2463_s30 }
0x13bf   :  { %v1225_v58 = vpop.permute.xlu1 %1224 }
0x13c0   :  { %v1227_v59 = vadd.f32 %v1225_v58, %v1217_v27 }
0x13c2   :  { %2406 = vtanh.f32 %v1227_v59 }
0x13cc   :  { %v2407_v60 = vpop.eup %2406 }
0x13cd   :  { %1230 = vrot.lane.b32.xlu0 %v2407_v60, %s2462_s29 }
0x143f   :  { %v1231_v62 = vpop.permute.xlu0 %1230 }
0x1440   :  { %v1233_v63 = vmul.f32 %v1231_v62, %v1216_v53 }
0x1442   :  { %1235 = vrot.lane.b32.xlu1 %v1233_v63, %s2463_s30  ;;  %v1030_v63 = vadd.f32 %v2752_v43, %v2726_v3 }
0x14b4   :  { %v1236_v0 = vpop.permute.xlu1 %1235 }
0x14b5   :  { %2165 = vmatmul.mubr.msk.f32.vlgmr.msra.gmra.mrb[14].mxu1 %vm202_vm2, %v1236_v0 }
0x14b6   :  { %2298 = vmatpush3.bf16.msra.mxu1 %v2691_v54  ;;  %2186 = vmatprep.mubr.msk.f32.mxu1 %vm2460_vm1, %v2461_v22 }
0x14b7   :  { %2299 = vmatprep.subr.bf16.mxu1 %v2459_v17 }
0x14ba   :  { %2301 = vmatpush3.bf16.msra.mxu1 %v2701_v57 }
0x14bb   :  { %2200 = vmatprep.subr.mxu1 %v2461_v22 }
0x1588   :  { %v1305_v2 = vpop.f32.mrb[14].mxu1 }
0x1589   :  { %v1309_v4 = vadd.f32 %v1305_v2, %v1015_v1  ;;  %v2166_v5 = vpop.f32.mrb[15].mxu1 }
0x158b   :  { %v1906_v6 = vmul.f32 -1.442695, %v1309_v4 }
0x158d   :  { %2408 = vpow2.f32 %v1906_v6 }
0x158e   :  { %2410 = vtanh.f32 %v1309_v4 }
0x1597   :  { %v2409_v8 = vpop.eup %2408 }
0x1598   :  { %v1313_v10 = vadd.f32 1.0, %v2409_v8  ;;  %v2411_v11 = vpop.eup %2410 }
0x159a   :  { %2412 = vrcp.f32 %v1313_v10 }
0x15a4   :  { %v2413_v14 = vpop.eup %2412 }
0x15a5   :  { %v1317_v61 = vsel %vm2586_vm5, %v2411_v11, %v2413_v14 }
0x15a6   :  { %1320 = vrot.lane.b32.xlu0 %v1317_v61, %s2462_s29  ;;  %v1318_v41 = vmul.f32 %v1317_v61, %v1227_v59 }
0x1618   :  { %v1321_v13 = vpop.permute.xlu0 %1320 }
0x1619   :  { %v1323_v12 = vmul.f32 %v1321_v13, %v1317_v61 }
0x161b   :  { %1325 = vrot.lane.b32.xlu1 %v1323_v12, %s2463_s30  ;;  %v1671_v12 = vld [vmem:[%s2865_s4 + $0x20] sm:$0xff] }
0x168d   :  { %v1326_v16 = vpop.permute.xlu1 %1325 }
0x168e   :  { %v1328_v21 = vadd.f32 %v1326_v16, %v1318_v41  ;;  %v1670_v41 = vld [vmem:[%s2863_s2] sm:$0xff]  ;;  %v1667_v16 = vld [vmem:[%s2865_s4 + $0x8] sm:$0xff]  ;;  %s1914_s2 = sld [smem:[#allocation3 + $0x1]] }
0x1690   :  { %2414 = vtanh.f32 %v1328_v21 }
0x1694   :  { %s1859_s15 = scalar_lea.vmem %s2865_s4, %s1914_s2 }
0x169a   :  { %v2415_v18 = vpop.eup %2414 }
0x169b   :  { %1331 = vrot.lane.b32.xlu0 %v2415_v18, %s2462_s29  ;;  %v1669_v18 = vld [vmem:[%s2865_s4 + $0x18] sm:$0xff] }
0x170d   :  { %v1332_v7 = vpop.permute.xlu0 %1331 }
0x170e   :  { %v1334_v19 = vmul.f32 %v1332_v7, %v1317_v61  ;;  %v2309_v7 = vpack.c.bf16 %v1667_v16, %v1666_v9 }
0x1710   :  { %1336 = vrot.lane.b32.xlu1 %v1334_v19, %s2463_s30 }
0x1782   :  { %v1337_v20 = vpop.permute.xlu1 %1336 }
0x1783   :  { %2176 = vmatmul.mubr.msk.f32.vlgmr.msra.gmra.mrb[20].mxu0 %vm202_vm2, %v1337_v20 }
0x1784   :  { %2304 = vmatpush3.bf16.msra.mxu0 %v2691_v54  ;;  %2197 = vmatprep.mubr.msk.f32.mxu0 %vm2460_vm1, %v2461_v22 }
0x1785   :  { %2305 = vmatprep.subr.bf16.mxu0 %v2459_v17 }
0x1788   :  { %2307 = vmatpush3.bf16.msra.mxu0 %v2701_v57 }
0x1856   :  { %v1406_v24 = vpop.f32.mrb[20].mxu0 }
0x1857   :  { %v1410_v25 = vadd.f32 %v1406_v24, %v1020_v23  ;;  %v2177_v26 = vpop.f32.mrb[21].mxu0 }
0x1859   :  { %v1908_v28 = vmul.f32 -1.442695, %v1410_v25 }
0x185b   :  { %2416 = vpow2.f32 %v1908_v28 }
0x185c   :  { %2418 = vtanh.f32 %v1410_v25 }
0x1865   :  { %v2417_v29 = vpop.eup %2416 }
0x1866   :  { %v1414_v30 = vadd.f32 1.0, %v2417_v29  ;;  %v2419_v54 = vpop.eup %2418 }
0x1868   :  { %2420 = vrcp.f32 %v1414_v30  ;;  %v1913_v30 = vld [vmem:[%s1857_s19 + $0x28] sm:$0x1] }
0x1872   :  { %v2421_v31 = vpop.eup %2420 }
0x1873   :  { %v1418_v32 = vsel %vm2586_vm5, %v2419_v54, %v2421_v31  ;;  %v1917_v31 = vld [vmem:[%s1861_s21 + $0x38] sm:$0x1] }
0x1874   :  { %1421 = vrot.lane.b32.xlu0 %v1418_v32, %s2462_s29  ;;  %v1419_v40 = vmul.f32 %v1418_v32, %v1328_v21  ;;  %v1668_v21 = vld [vmem:[%s2865_s4 + $0x10] sm:$0xff] }
0x1875   :  { %v2312_v19 = vpack.c.bf16 %v1669_v18, %v1668_v21 }
0x18e6   :  { %v1422_v57 = vpop.permute.xlu0 %1421 }
0x18e7   :  { %v1424_v33 = vmul.f32 %v1422_v57, %v1418_v32 }
0x18e9   :  { %1426 = vrot.lane.b32.xlu1 %v1424_v33, %s2463_s30 }
0x195b   :  { %v1427_v34 = vpop.permute.xlu1 %1426 }
0x195c   :  { %v1429_v35 = vadd.f32 %v1427_v34, %v1419_v40 }
0x195e   :  { %2422 = vtanh.f32 %v1429_v35 }
0x1968   :  { %v2423_v36 = vpop.eup %2422 }
0x1969   :  { %1432 = vrot.lane.b32.xlu0 %v2423_v36, %s2462_s29 }
0x19db   :  { %v1433_v37 = vpop.permute.xlu0 %1432 }
0x19dc   :  { %v1435_v38 = vmul.f32 %v1433_v37, %v1418_v32 }
0x19de   :  { %1437 = vrot.lane.b32.xlu1 %v1435_v38, %s2463_s30  ;;  %v1922_v38 = vld [vmem:[%s2865_s4 + $0x40] ss:$0 sm:$0xff] }
0x1a50   :  { %v1438_v39 = vpop.permute.xlu1 %1437 }
0x1a51   :  { %2187 = vmatmul.mubr.msk.f32.vlgmr.msra.gmra.mrb[16].mxu1 %vm202_vm2, %v1438_v39 }
0x1a52   :  { %2202 = vmatprep.mubr.msk.f32.mxu1 %vm2460_vm1, %v2461_v22  ;;  %2201 = vmatpush3.msra.mxu1 %v1671_v12 }
0x1a53   :  { %2308 = vmatprep.subr.bf16.mxu1 %v2459_v17 }
0x1a55   :  { %2203 = vmatmul.mubr.msk.f32.vlgmr.msra.gmra.mrb[18].mxu1 %vm1672_vm6, %v1670_v41 }
0x1a56   :  { %2213 = vmatprep.mubr.msk.f32.mxu1 %vm2460_vm1, %v2461_v22  ;;  %2310 = vmatpush3.bf16.msra.mxu1 %v2309_v7 }
0x1a57   :  { %2311 = vmatprep.subr.bf16.mxu1 %v2459_v17  ;;  %v1915_v17 = vld [vmem:[%s1859_s15 + $0x28] sm:$0x1] }
0x1a58   :  { %v1647_v29 = vrot.slane %v1915_v17, 7 }
0x1a5a   :  { %2313 = vmatpush3.bf16.msra.mxu1 %v2312_v19  ;;  %v1650_v32 = vsel %vm1649_vm7, %v1913_v30, %v1647_v29 }
0x1a5b   :  { %v1652_v33 = vsel %vm1651_vm8, %v1650_v32, 0.0 }
0x1b24   :  { %v1507_v45 = vpop.f32.mrb[16].mxu1 }
0x1b25   :  { %v1511_v15 = vadd.f32 %v1507_v45, %v1025_v42  ;;  %v2188_v46 = vpop.f32.mrb[17].mxu1 }
0x1b27   :  { %v1910_v47 = vmul.f32 -1.442695, %v1511_v15 }
0x1b28   :  { %v1742_v25 = vpop.f32.mrb[18].mxu1 }
0x1b29   :  { %2424 = vpow2.f32 %v1910_v47  ;;  %v2204_v26 = vpop.f32.mrb[19].mxu1 }
0x1b2a   :  { %2426 = vtanh.f32 %v1511_v15 }
0x1b33   :  { %v2425_v48 = vpop.eup %2424 }
0x1b34   :  { %v1515_v49 = vadd.f32 1.0, %v2425_v48  ;;  %v2427_v50 = vpop.eup %2426  ;;  %v1924_v48 = vld [vmem:[%s2865_s4 + $0x41] ss:$0 sm:$0xff] }
0x1b36   :  { %2428 = vrcp.f32 %v1515_v49 }
0x1b40   :  { %v2429_v51 = vpop.eup %2428 }
0x1b41   :  { %v1519_v52 = vsel %vm2586_vm5, %v2427_v50, %v2429_v51 }
0x1b42   :  { %1522 = vrot.lane.b32.xlu0 %v1519_v52, %s2462_s29  ;;  %v1520_v44 = vmul.f32 %v1519_v52, %v1429_v35 }
0x1bb4   :  { %v1523_v53 = vpop.permute.xlu0 %1522 }
0x1bb5   :  { %v1525_v55 = vmul.f32 %v1523_v53, %v1519_v52 }
0x1bb7   :  { %1527 = vrot.lane.b32.xlu1 %v1525_v55, %s2463_s30 }
0x1c29   :  { %v1528_v56 = vpop.permute.xlu1 %1527 }
0x1c2a   :  { %v1530_v27 = vadd.f32 %v1528_v56, %v1520_v44 }
0x1c2c   :  { %2430 = vtanh.f32 %v1530_v27 }
0x1c36   :  { %v2431_v58 = vpop.eup %2430 }
0x1c37   :  { %1533 = vrot.lane.b32.xlu0 %v2431_v58, %s2462_s29 }
0x1ca9   :  { %v1534_v59 = vpop.permute.xlu0 %1533 }
0x1caa   :  { %v1536_v60 = vmul.f32 %v1534_v59, %v1519_v52  ;;  %v1925_v52 = vld [vmem:[%s2865_s4 + $0x42] ss:$0 sm:$0xff] }
0x1cac   :  { %1538 = vrot.lane.b32.xlu1 %v1536_v60, %s2463_s30 }
0x1d1e   :  { %v1539_v62 = vpop.permute.xlu1 %1538 }
0x1d1f   :  { %2198 = vmatmul.mubr.msk.f32.vlgmr.msra.gmra.mrb[22].mxu0 %vm202_vm2, %v1539_v62 }
0x1df2   :  { %v1608_v0 = vpop.f32.mrb[22].mxu0 }
0x1df3   :  { %v1612_v1 = vadd.f32 %v1608_v0, %v1030_v63  ;;  %v2199_v2 = vpop.f32.mrb[23].mxu0 }
0x1df5   :  { %v1912_v4 = vmul.f32 -1.442695, %v1612_v1 }
0x1df7   :  { %2432 = vpow2.f32 %v1912_v4 }
0x1df8   :  { %2434 = vtanh.f32 %v1612_v1 }
0x1e01   :  { %v2433_v5 = vpop.eup %2432 }
0x1e02   :  { %v1616_v6 = vadd.f32 1.0, %v2433_v5  ;;  %v2435_v8 = vpop.eup %2434 }
0x1e04   :  { %2436 = vrcp.f32 %v1616_v6 }
0x1e0e   :  { %v2437_v10 = vpop.eup %2436 }
0x1e0f   :  { %v1620_v11 = vsel %vm2586_vm5, %v2435_v8, %v2437_v10 }
0x1e10   :  { %1623 = vrot.lane.b32.xlu0 %v1620_v11, %s2462_s29  ;;  %v1621_v3 = vmul.f32 %v1620_v11, %v1530_v27 }
0x1e82   :  { %v1624_v14 = vpop.permute.xlu0 %1623 }
0x1e83   :  { %v1626_v61 = vmul.f32 %v1624_v14, %v1620_v11 }
0x1e85   :  { %1628 = vrot.lane.b32.xlu1 %v1626_v61, %s2463_s30 }
0x1ef7   :  { %v1629_v43 = vpop.permute.xlu1 %1628 }
0x1ef8   :  { %v1631_v13 = vadd.f32 %v1629_v43, %v1621_v3 }
0x1efa   :  { %2438 = vtanh.f32 %v1631_v13 }
0x1f04   :  { %v2439_v20 = vpop.eup %2438 }
0x1f05   :  { %1634 = vrot.lane.b32.xlu0 %v2439_v20, %s2462_s29  ;;  %s1863_s29 = scalar_lea.vmem %s2865_s4, %s1918_s10 }
0x1f06   :  { %v1919_v22 = vld [vmem:[%s1863_s29 + $0x38] sm:$0x1] }
0x1f07   :  { %v1662_v54 = vrot.slane %v1919_v22, 7 }
0x1f09   :  { %v1664_v57 = vsel %vm1649_vm7, %v1917_v31, %v1662_v54 }
0x1f0a   :  { %v1665_v36 = vsel %vm1651_vm8, %v1664_v57, 0.0 }
0x1f77   :  { %v1635_v23 = vpop.permute.xlu0 %1634 }
0x1f78   :  { %v1637_v24 = vmul.f32 %v1635_v23, %v1620_v11 }
0x1f7a   :  { %1747 = vrot.lane.b32.xlu1 %v1637_v24, %s2463_s30 }
0x1fec   :  { %v1748_v28 = vpop.permute.xlu1 %1747 }
0x1fed   :  { %2214 = vmatmul.mubr.msk.f32.vlgmr.msra.gmra.mrb[20].mxu1 %vm202_vm2, %v1748_v28 }
0x20c0   :  { %v1817_v40 = vpop.f32.mrb[20].mxu1 }
0x20c1   :  { %v1818_v34 = vadd.f32 %v1817_v40, %v1742_v25  ;;  %v2215_v35 = vpop.f32.mrb[21].mxu1 }
0x20c3   :  { %v1821_v37 = vadd.f32 %v1818_v34, %v1652_v33 }
0x20c5   :  { %v1822_v39 = vadd.f32 %v1821_v37, %v1665_v36 }
0x20c7   :  { %v1828_v42 = vadd.f32 %v1922_v38, %v1822_v39 }
0x20c9   :  { %v1923_v45 = vmul.f32 -1.442695, %v1828_v42 }
0x20cb   :  { %2440 = vpow2.f32 %v1923_v45 }
0x20d5   :  { %v2441_v15 = vpop.eup %2440 }
0x20d6   :  { %v1832_v46 = vadd.f32 1.0, %v2441_v15 }
0x20d8   :  { %2442 = vrcp.f32 %v1832_v46 }
0x20e2   :  { %v2443_v47 = vpop.eup %2442 }
0x20e3   :  { %v1835_v49 = vmul.f32 %v2443_v47, %v1828_v42 }
0x20e5   :  { %v1841_v50 = vmul.f32 %v1924_v48, %v1835_v49 }
0x20e7   :  { %v1842_v51 = vsel %vm202_vm2, %v1841_v50, 0.0 }
0x20e8   :  { %1843 = vadd.xlane.f32.xlu0 %v1842_v51 }
0x2175   :  { %v1844_v53 = vpop.xlane.xlu0 %1843 }
0x2176   :  { %v1850_v55 = vadd.f32 %v1925_v52, %v1844_v53 }
0x2178   :  { %1852 = vst.msk [vmem:[%s2866_s5] sm:$0xff] %vm1851_vm9, %v1850_v55 }

</bundles_post_ra>
